<compile_context>
chip_gen: v7x
topology: tpu7x:2x2x1
jax: 0.10.0
libtpu: 0.0.40
codegen_flags: <defaults>
</compile_context>

<pallas_src>
import math
from functools import partial

import numpy as np
import jax
import jax.numpy as jnp
from jax.experimental import pallas as pl
from jax.experimental.pallas import tpu as pltpu

NUM_LEVELS = 4
CHANS = (3, 8, 16, 16, 16)      # synthetic backbone channel progression
CIN_PAD = 4                     # level-0 input channels padded 3 -> 4 (lane aligned)
EMBED_DIM = 32                  # neck / feature dim


# ---------------------------------------------------------------------------
# Host-side (one-time) weight folding
# ---------------------------------------------------------------------------
def _fold_conv_taps(w_conv, w_in, cin_pad=None):
    """Fold the 3x3/stride-2/pad-1 conv's column taps + channel contraction
    into ONE stacked matrix (all 3 row taps along K):
        M[i*W*Cin + w*Cin + c, wo*Cout + co] = w_conv[co, c, i, w - 2*wo + 1]
    so that  level_out = A_taps @ M  where
        A_taps[r, i*W*Cin + w*Cin + c] = input[2*ho + i - 1, w, c]  (zero pad)."""
    cout, cin, kh, kw = w_conv.shape
    if cin_pad is not None and cin_pad > cin:
        w_conv = np.pad(w_conv, ((0, 0), (0, cin_pad - cin), (0, 0), (0, 0)))
        cin = cin_pad
    wo_n = w_in // 2
    M = np.zeros((kh, w_in * cin, wo_n * cout), np.float32)
    for i in range(kh):
        for wo in range(wo_n):
            for j in range(kw):
                w = 2 * wo + j - 1
                if 0 <= w < w_in:
                    M[i, w * cin:(w + 1) * cin, wo * cout:(wo + 1) * cout] = (
                        w_conv[:, :, i, j].T)
    return M.reshape(kh * w_in * cin, wo_n * cout)


def _neck_block_diag(w_neck, wo_n):
    """Block-diagonal 1x1-conv weight: (Wo*Cin, Wo*E); keeps the neck a pure
    2-D matmul on the [rows, Wo*Cin] conv output, producing [rows, Wo*E]."""
    e, cin = w_neck.shape
    N = np.zeros((wo_n * cin, wo_n * e), np.float32)
    for wo in range(wo_n):
        N[wo * cin:(wo + 1) * cin, wo * e:(wo + 1) * e] = w_neck.T
    return N


def init_params(key, H, W, embed_dim=EMBED_DIM):
    """Deterministic synthetic backbone+neck weights.
    Returns (kernel_params, raw_params):
      kernel_params: per level (M[3*W*Cin, Wo*Cout] bf16,
                                N[Wo*Cout, Wo*E]      bf16,
                                B[2, Wo*E]            f32   (row0 conv bias,
                                                             row1 neck bias))
      raw_params:    torch-layout conv/neck weights for the pure-JAX reference."""
    kernel_params, raw_convs, raw_necks = [], [], []
    h_in, w_in = H, W
    for li in range(NUM_LEVELS):
        cin, cout = CHANS[li], CHANS[li + 1]
        ho_n, wo_n = h_in // 2, w_in // 2
        key, k1, k2, k3, k4 = jax.random.split(key, 5)
        w_conv = (np.asarray(jax.random.normal(k1, (cout, cin, 3, 3), jnp.float32))
                  / math.sqrt(cin * 9)).astype(np.float32)
        b_conv = (0.1 * np.asarray(jax.random.normal(k2, (cout,), jnp.float32))
                  ).astype(np.float32)
        w_neck = (np.asarray(jax.random.normal(k3, (embed_dim, cout), jnp.float32))
                  / math.sqrt(cout)).astype(np.float32)
        b_neck = (0.1 * np.asarray(jax.random.normal(k4, (embed_dim,), jnp.float32))
                  ).astype(np.float32)
        raw_convs.append((jnp.asarray(w_conv, jnp.float32),
                          jnp.asarray(b_conv, jnp.float32)))
        raw_necks.append((jnp.asarray(w_neck, jnp.float32),
                          jnp.asarray(b_neck, jnp.float32)))

        m = _fold_conv_taps(w_conv, w_in, cin_pad=CIN_PAD if li == 0 else None)
        n = _neck_block_diag(w_neck, wo_n)
        b2 = np.zeros((2, wo_n * embed_dim), np.float32)
        b2[0, :wo_n * cout] = np.tile(b_conv, wo_n)      # conv bias row
        b2[1, :] = np.tile(b_neck, wo_n)                 # neck bias row
        kernel_params.append((jnp.asarray(m, jnp.bfloat16),
                              jnp.asarray(n, jnp.bfloat16),
                              jnp.asarray(b2, jnp.float32)))
        h_in, w_in = ho_n, wo_n
    return kernel_params, {"convs": raw_convs, "necks": raw_necks}


# ---------------------------------------------------------------------------
# Pallas kernel: entire backbone + fused necks; cameras stacked along rows
# ---------------------------------------------------------------------------
def _make_kernel(cps, cam_rows, scratch_cols, h0, level_dims):
    n_lv = len(level_dims)

    def kernel(x_ref, *refs):
        w_refs = refs[:3 * n_lv]
        o_refs = refs[3 * n_lv:3 * n_lv + n_lv]
        s_ref = refs[-1]                               # f32 VMEM activation scratch
        wcin0 = level_dims[0][1]

        # Stage the stacked camera images into the scratch.  Row 0 of every
        # camera block is the "row -1" zero pad of the stride-2/pad-1 conv.
        for c in range(cps):
            base = c * cam_rows
            s_ref[pl.ds(base, 1), pl.ds(0, scratch_cols)] = jnp.zeros(
                (1, scratch_cols), jnp.float32)
            s_ref[pl.ds(base + 1, h0), pl.ds(0, wcin0)] = x_ref[c]

        for lv in range(n_lv):
            _, wcin, ho, wocout, _ = level_dims[lv]
            m_ref, n_ref, b_ref = w_refs[3 * lv:3 * lv + 3]

            # Gather the 3 row taps with strided sublane loads (vld slot),
            # one camera at a time so the zero pad row stays camera-local.
            cams = []
            for c in range(cps):
                base = c * cam_rows
                taps = [s_ref[pl.ds(base + i, ho, stride=2), pl.ds(0, wcin)]
                        for i in range(3)]
                cams.append(jnp.concatenate(taps, axis=1))    # (Ho, 3*W*Cin)
            a_ds = cams[0] if cps == 1 else jnp.concatenate(cams, axis=0)

            # ONE MXU matmul per level does the whole 3x3/stride-2 conv.
            z = jnp.dot(a_ds.astype(jnp.bfloat16), m_ref[...],
                        preferred_element_type=jnp.float32)
            act = jnp.maximum(z + b_ref[0:1, 0:wocout], 0.0)  # (cps*Ho, Wo*Cout) f32

            # Fused 1x1 neck (block-diagonal): [rows, Wo*E] token slab.
            t = jnp.dot(act.astype(jnp.bfloat16), n_ref[...],
                        preferred_element_type=jnp.float32) + b_ref[1:2, :]
            for c in range(cps):
                o_refs[lv][c] = t[c * ho:(c + 1) * ho, :]     # lane-dense store

            # Write next level's input back into the scratch (rows 1..Ho per
            # camera; row 0 stays the zero pad).
            if lv + 1 < n_lv:
                for c in range(cps):
                    base = c * cam_rows
                    s_ref[pl.ds(base + 1, ho), pl.ds(0, wocout)] = (
                        act[c * ho:(c + 1) * ho, :])

    return kernel


def _tensorcores_per_device():
    """Best-effort: 2 grid steps on multi-TensorCore parts (v7x / megacore),
    otherwise stack everything into a single step."""
    try:
        kind = jax.devices()[0].device_kind.lower()
    except Exception:
        return 1
    if "v7" in kind or "v4" in kind or "v5p" in kind:
        return 2
    return 1


# ---------------------------------------------------------------------------
# Sparse4DBackbone.forward: extract_feat(img) -> feature
# ---------------------------------------------------------------------------
@partial(jax.jit, static_argnames=("embed_dim",))
def sparse4d_backbone_forward(img, kernel_params, embed_dim=EMBED_DIM):
    bs, num_cams, cin, H, W = img.shape
    BN = bs * num_cams

    # NCHW -> channels-last, pad Cin 3->4 so the level-0 activation is
    # (H, W*4) with a 128-aligned lane width.  Single tiny transpose of the
    # raw input; everything downstream stays channels-last.
    x = img.reshape(BN, cin, H, W).transpose(0, 2, 3, 1)          # [BN,H,W,C]
    x = jnp.pad(x, ((0, 0), (0, 0), (0, 0), (0, CIN_PAD - cin)))
    x2d = x.reshape(BN, H, W * CIN_PAD)

    # Static per-level dims derived from the folded weights.
    level_dims = []
    h, w = H, W
    for m, n, _ in kernel_params:
        wcin, wocout, woe = m.shape[0] // 3, m.shape[1], n.shape[1]
        ho, wo = h // 2, w // 2
        level_dims.append((h, wcin, ho, wocout, woe))
        h, w = ho, wo
    level_dims = tuple(level_dims)

    # Camera stacking: 1 grid step on v5e/v6e, 2 on multi-core parts.
    steps = _tensorcores_per_device()
    if steps > BN or BN % steps:
        steps = 1
    cps = BN // steps                                   # cameras per grid step

    cam_rows = ((H + 1 + 7) // 8) * 8                   # per-camera scratch rows
    scratch_cols = max(d[1] for d in level_dims)        # = W*CIN_PAD here

    weight_arrays, weight_specs = [], []
    for level in kernel_params:
        for arr in level:
            weight_arrays.append(arr)
            weight_specs.append(pl.BlockSpec(arr.shape, lambda g: (0, 0)))

    out_shape = tuple(jax.ShapeDtypeStruct((BN, ho, woe), jnp.float32)
                      for (_, _, ho, _, woe) in level_dims)
    out_specs = tuple(pl.BlockSpec((cps, ho, woe), lambda g: (g, 0, 0))
                      for (_, _, ho, _, woe) in level_dims)

    kernel = _make_kernel(cps, cam_rows, scratch_cols, H, level_dims)
    level_feats = pl.pallas_call(
        kernel,
        out_shape=out_shape,
        grid=(steps,),
        in_specs=[pl.BlockSpec((cps, H, W * CIN_PAD), lambda g: (g, 0, 0))]
                 + weight_specs,
        out_specs=out_specs,
        scratch_shapes=[pltpu.VMEM((cps * cam_rows, scratch_cols), jnp.float32)],
        compiler_params=pltpu.CompilerParams(
            dimension_semantics=("parallel",)),
    )(x2d, *weight_arrays)

    # [BN, Ho, Wo*E] is already the row-major [BN, Ho*Wo, E] token layout.
    tokens = [f.reshape(BN, -1, embed_dim) for f in level_feats]
    feature = jnp.concatenate(tokens, axis=1)                # [BN, sum(HW), E]
    return feature.reshape(bs, num_cams, -1, embed_dim)      # [bs, cams, tokens, E]


# ---------------------------------------------------------------------------
# Pure-JAX reference (f32) for a numerical sanity check
# ---------------------------------------------------------------------------
def _reference_forward(img, raw_params, embed_dim=EMBED_DIM):
    bs, num_cams, c, H, W = img.shape
    x = img.reshape(bs * num_cams, c, H, W)
    tokens = []
    for (wc, bc), (wn, bn) in zip(raw_params["convs"], raw_params["necks"]):
        x = jax.lax.conv_general_dilated(
            x, wc, window_strides=(2, 2), padding=((1, 1), (1, 1)),
            dimension_numbers=("NCHW", "OIHW", "NCHW"))
        x = jnp.maximum(x + bc[None, :, None, None], 0.0)
        t = jnp.einsum("bchw,ec->bhwe", x, wn) + bn
        tokens.append(t.reshape(x.shape[0], -1, embed_dim))
    feature = jnp.concatenate(tokens, axis=1)
    return feature.reshape(bs, num_cams, -1, embed_dim)


if __name__ == "__main__":
    key = jax.random.PRNGKey(0)
    k_img, k_par = jax.random.split(key)
    # small shapes: bs=1, num_cams=2, 3x32x32 images
    img = jax.random.normal(k_img, (1, 2, 3, 32, 32), jnp.float32)
    kernel_params, raw_params = init_params(k_par, H=32, W=32, embed_dim=EMBED_DIM)

    feature = sparse4d_backbone_forward(img, kernel_params, embed_dim=EMBED_DIM)
    feature = jax.block_until_ready(feature)

    # 4 levels: 16*16 + 8*8 + 4*4 + 2*2 = 340 tokens per camera
    assert feature.shape == (1, 2, 340, EMBED_DIM), feature.shape
    assert feature.dtype == jnp.float32

    # loose tolerance: MXU operands are bf16, accumulation is f32
    ref = _reference_forward(img, raw_params, embed_dim=EMBED_DIM)
    err = float(jnp.max(jnp.abs(feature - ref)))
    assert err < 0.25, f"max abs error vs f32 reference: {err}"
    print("KERNEL_OK")
</pallas_src>

<mosaic_0001>
module attributes {stable_mosaic.version = 11 : i64} {
  func.func @kernel(%arg0: i32, %arg1: memref<2x32x128xf32, #tpu.memory_space<vmem>>, %arg2: memref<384x128xbf16, #tpu.memory_space<vmem>>, %arg3: memref<128x512xbf16, #tpu.memory_space<vmem>>, %arg4: memref<2x512xf32, #tpu.memory_space<vmem>>, %arg5: memref<384x128xbf16, #tpu.memory_space<vmem>>, %arg6: memref<128x256xbf16, #tpu.memory_space<vmem>>, %arg7: memref<2x256xf32, #tpu.memory_space<vmem>>, %arg8: memref<384x64xbf16, #tpu.memory_space<vmem>>, %arg9: memref<64x128xbf16, #tpu.memory_space<vmem>>, %arg10: memref<2x128xf32, #tpu.memory_space<vmem>>, %arg11: memref<192x32xbf16, #tpu.memory_space<vmem>>, %arg12: memref<32x64xbf16, #tpu.memory_space<vmem>>, %arg13: memref<2x64xf32, #tpu.memory_space<vmem>>, %arg14: memref<2x16x512xf32, #tpu.memory_space<vmem>>, %arg15: memref<2x8x256xf32, #tpu.memory_space<vmem>>, %arg16: memref<2x4x128xf32, #tpu.memory_space<vmem>>, %arg17: memref<2x2x64xf32, #tpu.memory_space<vmem>>, %arg18: memref<80x128xf32, #tpu.memory_space<vmem>>) attributes {dimension_semantics = [#tpu.dimension_semantics<parallel>], iteration_bounds = array<i64: 1>, scalar_prefetch = 0 : i64, scratch_operands = 1 : i64, tpu.core_type = #tpu.core_type<tc>, window_params = [{transform_indices = @transform_0, window_bounds = array<i64: 2, 32, 128>}, {pipeline_mode = #tpu.pipeline_mode<synchronous>, transform_indices = @transform_1, window_bounds = array<i64: 384, 128>}, {pipeline_mode = #tpu.pipeline_mode<synchronous>, transform_indices = @transform_2, window_bounds = array<i64: 128, 512>}, {pipeline_mode = #tpu.pipeline_mode<synchronous>, transform_indices = @transform_3, window_bounds = array<i64: 2, 512>}, {pipeline_mode = #tpu.pipeline_mode<synchronous>, transform_indices = @transform_4, window_bounds = array<i64: 384, 128>}, {pipeline_mode = #tpu.pipeline_mode<synchronous>, transform_indices = @transform_5, window_bounds = array<i64: 128, 256>}, {pipeline_mode = #tpu.pipeline_mode<synchronous>, transform_indices = @transform_6, window_bounds = array<i64: 2, 256>}, {pipeline_mode = #tpu.pipeline_mode<synchronous>, transform_indices = @transform_7, window_bounds = array<i64: 384, 64>}, {pipeline_mode = #tpu.pipeline_mode<synchronous>, transform_indices = @transform_8, window_bounds = array<i64: 64, 128>}, {pipeline_mode = #tpu.pipeline_mode<synchronous>, transform_indices = @transform_9, window_bounds = array<i64: 2, 128>}, {pipeline_mode = #tpu.pipeline_mode<synchronous>, transform_indices = @transform_10, window_bounds = array<i64: 192, 32>}, {pipeline_mode = #tpu.pipeline_mode<synchronous>, transform_indices = @transform_11, window_bounds = array<i64: 32, 64>}, {pipeline_mode = #tpu.pipeline_mode<synchronous>, transform_indices = @transform_12, window_bounds = array<i64: 2, 64>}, {transform_indices = @transform_13, window_bounds = array<i64: 2, 16, 512>}, {transform_indices = @transform_14, window_bounds = array<i64: 2, 8, 256>}, {transform_indices = @transform_15, window_bounds = array<i64: 2, 4, 128>}, {transform_indices = @transform_16, window_bounds = array<i64: 2, 2, 64>}]} {
    %cst = arith.constant 0.000000e+00 : f32
    %0 = vector.broadcast %cst : f32 to vector<1x128xf32>
    %c0 = arith.constant 0 : index
    %c0_0 = arith.constant 0 : index
    %1 = vector.load %arg18[%c0, %c0_0] : memref<80x128xf32, #tpu.memory_space<vmem>>, vector<1x128xf32>
    tpu.vector_store %arg18[%c0, %c0_0], %0 {strides = array<i32>} : memref<80x128xf32, #tpu.memory_space<vmem>>, vector<1x128xf32>,
    %c0_1 = arith.constant 0 : index
    %c0_2 = arith.constant 0 : index
    %c0_3 = arith.constant 0 : index
    %2 = vector.load %arg1[%c0_1, %c0_2, %c0_3] : memref<2x32x128xf32, #tpu.memory_space<vmem>>, vector<1x32x128xf32>
    %3 = vector.shape_cast %2 : vector<1x32x128xf32> to vector<32x128xf32>
    %c1 = arith.constant 1 : index
    %c0_4 = arith.constant 0 : index
    %4 = vector.load %arg18[%c1, %c0_4] : memref<80x128xf32, #tpu.memory_space<vmem>>, vector<32x128xf32>
    tpu.vector_store %arg18[%c1, %c0_4], %3 {strides = array<i32>} : memref<80x128xf32, #tpu.memory_space<vmem>>, vector<32x128xf32>,
    %cst_5 = arith.constant 0.000000e+00 : f32
    %5 = vector.broadcast %cst_5 : f32 to vector<1x128xf32>
    %c40 = arith.constant 40 : index
    %c0_6 = arith.constant 0 : index
    %6 = vector.load %arg18[%c40, %c0_6] : memref<80x128xf32, #tpu.memory_space<vmem>>, vector<1x128xf32>
    tpu.vector_store %arg18[%c40, %c0_6], %5 {strides = array<i32>} : memref<80x128xf32, #tpu.memory_space<vmem>>, vector<1x128xf32>,
    %c1_7 = arith.constant 1 : index
    %c0_8 = arith.constant 0 : index
    %c0_9 = arith.constant 0 : index
    %7 = vector.load %arg1[%c1_7, %c0_8, %c0_9] : memref<2x32x128xf32, #tpu.memory_space<vmem>>, vector<1x32x128xf32>
    %8 = vector.shape_cast %7 : vector<1x32x128xf32> to vector<32x128xf32>
    %c41 = arith.constant 41 : index
    %c0_10 = arith.constant 0 : index
    %9 = vector.load %arg18[%c41, %c0_10] : memref<80x128xf32, #tpu.memory_space<vmem>>, vector<32x128xf32>
    tpu.vector_store %arg18[%c41, %c0_10], %8 {strides = array<i32>} : memref<80x128xf32, #tpu.memory_space<vmem>>, vector<32x128xf32>,
    %c0_11 = arith.constant 0 : index
    %c0_12 = arith.constant 0 : index
    %10 = tpu.strided_load %arg18[%c0_11, %c0_12] {strides = array<i32: 2, 1>} : memref<80x128xf32, #tpu.memory_space<vmem>>, vector<16x128xf32>
    %c1_13 = arith.constant 1 : index
    %c0_14 = arith.constant 0 : index
    %11 = tpu.strided_load %arg18[%c1_13, %c0_14] {strides = array<i32: 2, 1>} : memref<80x128xf32, #tpu.memory_space<vmem>>, vector<16x128xf32>
    %c2 = arith.constant 2 : index
    %c0_15 = arith.constant 0 : index
    %12 = tpu.strided_load %arg18[%c2, %c0_15] {strides = array<i32: 2, 1>} : memref<80x128xf32, #tpu.memory_space<vmem>>, vector<16x128xf32>
    %13 = tpu.concatenate %10, %11, %12 in 1 : vector<16x128xf32>, vector<16x128xf32>, vector<16x128xf32> -> vector<16x384xf32>
    %c40_16 = arith.constant 40 : index
    %c0_17 = arith.constant 0 : index
    %14 = tpu.strided_load %arg18[%c40_16, %c0_17] {strides = array<i32: 2, 1>} : memref<80x128xf32, #tpu.memory_space<vmem>>, vector<16x128xf32>
    %c41_18 = arith.constant 41 : index
    %c0_19 = arith.constant 0 : index
    %15 = tpu.strided_load %arg18[%c41_18, %c0_19] {strides = array<i32: 2, 1>} : memref<80x128xf32, #tpu.memory_space<vmem>>, vector<16x128xf32>
    %c42 = arith.constant 42 : index
    %c0_20 = arith.constant 0 : index
    %16 = tpu.strided_load %arg18[%c42, %c0_20] {strides = array<i32: 2, 1>} : memref<80x128xf32, #tpu.memory_space<vmem>>, vector<16x128xf32>
    %17 = tpu.concatenate %14, %15, %16 in 1 : vector<16x128xf32>, vector<16x128xf32>, vector<16x128xf32> -> vector<16x384xf32>
    %18 = tpu.concatenate %13, %17 in 0 : vector<16x384xf32>, vector<16x384xf32> -> vector<32x384xf32>
    %19 = arith.truncf %18 : vector<32x384xf32> to vector<32x384xbf16>
    %c0_21 = arith.constant 0 : index
    %c0_22 = arith.constant 0 : index
    %20 = vector.load %arg2[%c0_21, %c0_22] : memref<384x128xbf16, #tpu.memory_space<vmem>>, vector<384x128xbf16>
    %cst_23 = arith.constant dense<0.000000e+00> : vector<32x128xf32>
    %21 = tpu.matmul %19, %20, %cst_23 {dimension_numbers = #tpu.dot_dimension_numbers<[1], [0], [0], [1], [0, 0, 1, 1], [], []>} : vector<32x384xbf16>, vector<384x128xbf16>, vector<32x128xf32> -> vector<32x128xf32>
    %c0_24 = arith.constant 0 : index
    %c0_25 = arith.constant 0 : index
    %22 = vector.load %arg4[%c0_24, %c0_25] : memref<2x512xf32, #tpu.memory_space<vmem>>, vector<1x128xf32>
    %23 = vector.broadcast %22 : vector<1x128xf32> to vector<32x128xf32>
    %24 = arith.addf %21, %23 : vector<32x128xf32>
    %cst_26 = arith.constant 0.000000e+00 : f32
    %25 = vector.broadcast %cst_26 : f32 to vector<32x128xf32>
    %26 = arith.maximumf %24, %25 : vector<32x128xf32>
    %27 = arith.truncf %26 : vector<32x128xf32> to vector<32x128xbf16>
    %c0_27 = arith.constant 0 : index
    %c0_28 = arith.constant 0 : index
    %28 = vector.load %arg3[%c0_27, %c0_28] : memref<128x512xbf16, #tpu.memory_space<vmem>>, vector<128x512xbf16>
    %cst_29 = arith.constant dense<0.000000e+00> : vector<32x512xf32>
    %29 = tpu.matmul %27, %28, %cst_29 {dimension_numbers = #tpu.dot_dimension_numbers<[1], [0], [0], [1], [0, 0, 1, 1], [], []>} : vector<32x128xbf16>, vector<128x512xbf16>, vector<32x512xf32> -> vector<32x512xf32>
    %c1_30 = arith.constant 1 : index
    %c0_31 = arith.constant 0 : index
    %30 = vector.load %arg4[%c1_30, %c0_31] : memref<2x512xf32, #tpu.memory_space<vmem>>, vector<1x512xf32>
    %31 = vector.broadcast %30 : vector<1x512xf32> to vector<32x512xf32>
    %32 = arith.addf %29, %31 : vector<32x512xf32>
    %33 = vector.extract_strided_slice %32 {offsets = [0, 0], sizes = [16, 512], strides = [1, 1]} : vector<32x512xf32> to vector<16x512xf32>
    %c0_32 = arith.constant 0 : index
    %c0_33 = arith.constant 0 : index
    %c0_34 = arith.constant 0 : index
    %34 = vector.load %arg14[%c0_32, %c0_33, %c0_34] : memref<2x16x512xf32, #tpu.memory_space<vmem>>, vector<1x16x512xf32>
    %35 = vector.shape_cast %34 : vector<1x16x512xf32> to vector<16x512xf32>
    %36 = vector.shape_cast %33 : vector<16x512xf32> to vector<1x16x512xf32>
    tpu.vector_store %arg14[%c0_32, %c0_33, %c0_34], %36 {strides = array<i32>} : memref<2x16x512xf32, #tpu.memory_space<vmem>>, vector<1x16x512xf32>,
    %37 = vector.extract_strided_slice %32 {offsets = [16, 0], sizes = [16, 512], strides = [1, 1]} : vector<32x512xf32> to vector<16x512xf32>
    %c1_35 = arith.constant 1 : index
    %c0_36 = arith.constant 0 : index
    %c0_37 = arith.constant 0 : index
    %38 = vector.load %arg14[%c1_35, %c0_36, %c0_37] : memref<2x16x512xf32, #tpu.memory_space<vmem>>, vector<1x16x512xf32>
    %39 = vector.shape_cast %38 : vector<1x16x512xf32> to vector<16x512xf32>
    %40 = vector.shape_cast %37 : vector<16x512xf32> to vector<1x16x512xf32>
    tpu.vector_store %arg14[%c1_35, %c0_36, %c0_37], %40 {strides = array<i32>} : memref<2x16x512xf32, #tpu.memory_space<vmem>>, vector<1x16x512xf32>,
    %41 = vector.extract_strided_slice %26 {offsets = [0, 0], sizes = [16, 128], strides = [1, 1]} : vector<32x128xf32> to vector<16x128xf32>
    %c1_38 = arith.constant 1 : index
    %c0_39 = arith.constant 0 : index
    %42 = vector.load %arg18[%c1_38, %c0_39] : memref<80x128xf32, #tpu.memory_space<vmem>>, vector<16x128xf32>
    tpu.vector_store %arg18[%c1_38, %c0_39], %41 {strides = array<i32>} : memref<80x128xf32, #tpu.memory_space<vmem>>, vector<16x128xf32>,
    %43 = vector.extract_strided_slice %26 {offsets = [16, 0], sizes = [16, 128], strides = [1, 1]} : vector<32x128xf32> to vector<16x128xf32>
    %c41_40 = arith.constant 41 : index
    %c0_41 = arith.constant 0 : index
    %44 = vector.load %arg18[%c41_40, %c0_41] : memref<80x128xf32, #tpu.memory_space<vmem>>, vector<16x128xf32>
    tpu.vector_store %arg18[%c41_40, %c0_41], %43 {strides = array<i32>} : memref<80x128xf32, #tpu.memory_space<vmem>>, vector<16x128xf32>,
    %c0_42 = arith.constant 0 : index
    %c0_43 = arith.constant 0 : index
    %45 = tpu.strided_load %arg18[%c0_42, %c0_43] {strides = array<i32: 2, 1>} : memref<80x128xf32, #tpu.memory_space<vmem>>, vector<8x128xf32>
    %c1_44 = arith.constant 1 : index
    %c0_45 = arith.constant 0 : index
    %46 = tpu.strided_load %arg18[%c1_44, %c0_45] {strides = array<i32: 2, 1>} : memref<80x128xf32, #tpu.memory_space<vmem>>, vector<8x128xf32>
    %c2_46 = arith.constant 2 : index
    %c0_47 = arith.constant 0 : index
    %47 = tpu.strided_load %arg18[%c2_46, %c0_47] {strides = array<i32: 2, 1>} : memref<80x128xf32, #tpu.memory_space<vmem>>, vector<8x128xf32>
    %48 = tpu.concatenate %45, %46, %47 in 1 : vector<8x128xf32>, vector<8x128xf32>, vector<8x128xf32> -> vector<8x384xf32>
    %c40_48 = arith.constant 40 : index
    %c0_49 = arith.constant 0 : index
    %49 = tpu.strided_load %arg18[%c40_48, %c0_49] {strides = array<i32: 2, 1>} : memref<80x128xf32, #tpu.memory_space<vmem>>, vector<8x128xf32>
    %c41_50 = arith.constant 41 : index
    %c0_51 = arith.constant 0 : index
    %50 = tpu.strided_load %arg18[%c41_50, %c0_51] {strides = array<i32: 2, 1>} : memref<80x128xf32, #tpu.memory_space<vmem>>, vector<8x128xf32>
    %c42_52 = arith.constant 42 : index
    %c0_53 = arith.constant 0 : index
    %51 = tpu.strided_load %arg18[%c42_52, %c0_53] {strides = array<i32: 2, 1>} : memref<80x128xf32, #tpu.memory_space<vmem>>, vector<8x128xf32>
    %52 = tpu.concatenate %49, %50, %51 in 1 : vector<8x128xf32>, vector<8x128xf32>, vector<8x128xf32> -> vector<8x384xf32>
    %53 = tpu.concatenate %48, %52 in 0 : vector<8x384xf32>, vector<8x384xf32> -> vector<16x384xf32>
    %54 = arith.truncf %53 : vector<16x384xf32> to vector<16x384xbf16>
    %c0_54 = arith.constant 0 : index
    %c0_55 = arith.constant 0 : index
    %55 = vector.load %arg5[%c0_54, %c0_55] : memref<384x128xbf16, #tpu.memory_space<vmem>>, vector<384x128xbf16>
    %cst_56 = arith.constant dense<0.000000e+00> : vector<16x128xf32>
    %56 = tpu.matmul %54, %55, %cst_56 {dimension_numbers = #tpu.dot_dimension_numbers<[1], [0], [0], [1], [0, 0, 1, 1], [], []>} : vector<16x384xbf16>, vector<384x128xbf16>, vector<16x128xf32> -> vector<16x128xf32>
    %c0_57 = arith.constant 0 : index
    %c0_58 = arith.constant 0 : index
    %57 = vector.load %arg7[%c0_57, %c0_58] : memref<2x256xf32, #tpu.memory_space<vmem>>, vector<1x128xf32>
    %58 = vector.broadcast %57 : vector<1x128xf32> to vector<16x128xf32>
    %59 = arith.addf %56, %58 : vector<16x128xf32>
    %cst_59 = arith.constant 0.000000e+00 : f32
    %60 = vector.broadcast %cst_59 : f32 to vector<16x128xf32>
    %61 = arith.maximumf %59, %60 : vector<16x128xf32>
    %62 = arith.truncf %61 : vector<16x128xf32> to vector<16x128xbf16>
    %c0_60 = arith.constant 0 : index
    %c0_61 = arith.constant 0 : index
    %63 = vector.load %arg6[%c0_60, %c0_61] : memref<128x256xbf16, #tpu.memory_space<vmem>>, vector<128x256xbf16>
    %cst_62 = arith.constant dense<0.000000e+00> : vector<16x256xf32>
    %64 = tpu.matmul %62, %63, %cst_62 {dimension_numbers = #tpu.dot_dimension_numbers<[1], [0], [0], [1], [0, 0, 1, 1], [], []>} : vector<16x128xbf16>, vector<128x256xbf16>, vector<16x256xf32> -> vector<16x256xf32>
    %c1_63 = arith.constant 1 : index
    %c0_64 = arith.constant 0 : index
    %65 = vector.load %arg7[%c1_63, %c0_64] : memref<2x256xf32, #tpu.memory_space<vmem>>, vector<1x256xf32>
    %66 = vector.broadcast %65 : vector<1x256xf32> to vector<16x256xf32>
    %67 = arith.addf %64, %66 : vector<16x256xf32>
    %68 = vector.extract_strided_slice %67 {offsets = [0, 0], sizes = [8, 256], strides = [1, 1]} : vector<16x256xf32> to vector<8x256xf32>
    %c0_65 = arith.constant 0 : index
    %c0_66 = arith.constant 0 : index
    %c0_67 = arith.constant 0 : index
    %69 = vector.load %arg15[%c0_65, %c0_66, %c0_67] : memref<2x8x256xf32, #tpu.memory_space<vmem>>, vector<1x8x256xf32>
    %70 = vector.shape_cast %69 : vector<1x8x256xf32> to vector<8x256xf32>
    %71 = vector.shape_cast %68 : vector<8x256xf32> to vector<1x8x256xf32>
    tpu.vector_store %arg15[%c0_65, %c0_66, %c0_67], %71 {strides = array<i32>} : memref<2x8x256xf32, #tpu.memory_space<vmem>>, vector<1x8x256xf32>,
    %72 = vector.extract_strided_slice %67 {offsets = [8, 0], sizes = [8, 256], strides = [1, 1]} : vector<16x256xf32> to vector<8x256xf32>
    %c1_68 = arith.constant 1 : index
    %c0_69 = arith.constant 0 : index
    %c0_70 = arith.constant 0 : index
    %73 = vector.load %arg15[%c1_68, %c0_69, %c0_70] : memref<2x8x256xf32, #tpu.memory_space<vmem>>, vector<1x8x256xf32>
    %74 = vector.shape_cast %73 : vector<1x8x256xf32> to vector<8x256xf32>
    %75 = vector.shape_cast %72 : vector<8x256xf32> to vector<1x8x256xf32>
    tpu.vector_store %arg15[%c1_68, %c0_69, %c0_70], %75 {strides = array<i32>} : memref<2x8x256xf32, #tpu.memory_space<vmem>>, vector<1x8x256xf32>,
    %76 = vector.extract_strided_slice %61 {offsets = [0, 0], sizes = [8, 128], strides = [1, 1]} : vector<16x128xf32> to vector<8x128xf32>
    %c1_71 = arith.constant 1 : index
    %c0_72 = arith.constant 0 : index
    %77 = vector.load %arg18[%c1_71, %c0_72] : memref<80x128xf32, #tpu.memory_space<vmem>>, vector<8x128xf32>
    tpu.vector_store %arg18[%c1_71, %c0_72], %76 {strides = array<i32>} : memref<80x128xf32, #tpu.memory_space<vmem>>, vector<8x128xf32>,
    %78 = vector.extract_strided_slice %61 {offsets = [8, 0], sizes = [8, 128], strides = [1, 1]} : vector<16x128xf32> to vector<8x128xf32>
    %c41_73 = arith.constant 41 : index
    %c0_74 = arith.constant 0 : index
    %79 = vector.load %arg18[%c41_73, %c0_74] : memref<80x128xf32, #tpu.memory_space<vmem>>, vector<8x128xf32>
    tpu.vector_store %arg18[%c41_73, %c0_74], %78 {strides = array<i32>} : memref<80x128xf32, #tpu.memory_space<vmem>>, vector<8x128xf32>,
    %c0_75 = arith.constant 0 : index
    %c0_76 = arith.constant 0 : index
    %80 = tpu.strided_load %arg18[%c0_75, %c0_76] {strides = array<i32: 2, 1>} : memref<80x128xf32, #tpu.memory_space<vmem>>, vector<4x128xf32>
    %c1_77 = arith.constant 1 : index
    %c0_78 = arith.constant 0 : index
    %81 = tpu.strided_load %arg18[%c1_77, %c0_78] {strides = array<i32: 2, 1>} : memref<80x128xf32, #tpu.memory_space<vmem>>, vector<4x128xf32>
    %c2_79 = arith.constant 2 : index
    %c0_80 = arith.constant 0 : index
    %82 = tpu.strided_load %arg18[%c2_79, %c0_80] {strides = array<i32: 2, 1>} : memref<80x128xf32, #tpu.memory_space<vmem>>, vector<4x128xf32>
    %83 = tpu.concatenate %80, %81, %82 in 1 : vector<4x128xf32>, vector<4x128xf32>, vector<4x128xf32> -> vector<4x384xf32>
    %c40_81 = arith.constant 40 : index
    %c0_82 = arith.constant 0 : index
    %84 = tpu.strided_load %arg18[%c40_81, %c0_82] {strides = array<i32: 2, 1>} : memref<80x128xf32, #tpu.memory_space<vmem>>, vector<4x128xf32>
    %c41_83 = arith.constant 41 : index
    %c0_84 = arith.constant 0 : index
    %85 = tpu.strided_load %arg18[%c41_83, %c0_84] {strides = array<i32: 2, 1>} : memref<80x128xf32, #tpu.memory_space<vmem>>, vector<4x128xf32>
    %c42_85 = arith.constant 42 : index
    %c0_86 = arith.constant 0 : index
    %86 = tpu.strided_load %arg18[%c42_85, %c0_86] {strides = array<i32: 2, 1>} : memref<80x128xf32, #tpu.memory_space<vmem>>, vector<4x128xf32>
    %87 = tpu.concatenate %84, %85, %86 in 1 : vector<4x128xf32>, vector<4x128xf32>, vector<4x128xf32> -> vector<4x384xf32>
    %88 = tpu.concatenate %83, %87 in 0 : vector<4x384xf32>, vector<4x384xf32> -> vector<8x384xf32>
    %89 = arith.truncf %88 : vector<8x384xf32> to vector<8x384xbf16>
    %c0_87 = arith.constant 0 : index
    %c0_88 = arith.constant 0 : index
    %90 = vector.load %arg8[%c0_87, %c0_88] : memref<384x64xbf16, #tpu.memory_space<vmem>>, vector<384x64xbf16>
    %cst_89 = arith.constant dense<0.000000e+00> : vector<8x64xf32>
    %91 = tpu.matmul %89, %90, %cst_89 {dimension_numbers = #tpu.dot_dimension_numbers<[1], [0], [0], [1], [0, 0, 1, 1], [], []>} : vector<8x384xbf16>, vector<384x64xbf16>, vector<8x64xf32> -> vector<8x64xf32>
    %c0_90 = arith.constant 0 : index
    %c0_91 = arith.constant 0 : index
    %92 = vector.load %arg10[%c0_90, %c0_91] : memref<2x128xf32, #tpu.memory_space<vmem>>, vector<1x64xf32>
    %93 = vector.broadcast %92 : vector<1x64xf32> to vector<8x64xf32>
    %94 = arith.addf %91, %93 : vector<8x64xf32>
    %cst_92 = arith.constant 0.000000e+00 : f32
    %95 = vector.broadcast %cst_92 : f32 to vector<8x64xf32>
    %96 = arith.maximumf %94, %95 : vector<8x64xf32>
    %97 = arith.truncf %96 : vector<8x64xf32> to vector<8x64xbf16>
    %c0_93 = arith.constant 0 : index
    %c0_94 = arith.constant 0 : index
    %98 = vector.load %arg9[%c0_93, %c0_94] : memref<64x128xbf16, #tpu.memory_space<vmem>>, vector<64x128xbf16>
    %cst_95 = arith.constant dense<0.000000e+00> : vector<8x128xf32>
    %99 = tpu.matmul %97, %98, %cst_95 {dimension_numbers = #tpu.dot_dimension_numbers<[1], [0], [0], [1], [0, 0, 1, 1], [], []>} : vector<8x64xbf16>, vector<64x128xbf16>, vector<8x128xf32> -> vector<8x128xf32>
    %c1_96 = arith.constant 1 : index
    %c0_97 = arith.constant 0 : index
    %100 = vector.load %arg10[%c1_96, %c0_97] : memref<2x128xf32, #tpu.memory_space<vmem>>, vector<1x128xf32>
    %101 = vector.broadcast %100 : vector<1x128xf32> to vector<8x128xf32>
    %102 = arith.addf %99, %101 : vector<8x128xf32>
    %103 = vector.extract_strided_slice %102 {offsets = [0, 0], sizes = [4, 128], strides = [1, 1]} : vector<8x128xf32> to vector<4x128xf32>
    %c0_98 = arith.constant 0 : index
    %c0_99 = arith.constant 0 : index
    %c0_100 = arith.constant 0 : index
    %104 = vector.load %arg16[%c0_98, %c0_99, %c0_100] : memref<2x4x128xf32, #tpu.memory_space<vmem>>, vector<1x4x128xf32>
    %105 = vector.shape_cast %104 : vector<1x4x128xf32> to vector<4x128xf32>
    %106 = vector.shape_cast %103 : vector<4x128xf32> to vector<1x4x128xf32>
    tpu.vector_store %arg16[%c0_98, %c0_99, %c0_100], %106 {strides = array<i32>} : memref<2x4x128xf32, #tpu.memory_space<vmem>>, vector<1x4x128xf32>,
    %107 = vector.extract_strided_slice %102 {offsets = [4, 0], sizes = [4, 128], strides = [1, 1]} : vector<8x128xf32> to vector<4x128xf32>
    %c1_101 = arith.constant 1 : index
    %c0_102 = arith.constant 0 : index
    %c0_103 = arith.constant 0 : index
    %108 = vector.load %arg16[%c1_101, %c0_102, %c0_103] : memref<2x4x128xf32, #tpu.memory_space<vmem>>, vector<1x4x128xf32>
    %109 = vector.shape_cast %108 : vector<1x4x128xf32> to vector<4x128xf32>
    %110 = vector.shape_cast %107 : vector<4x128xf32> to vector<1x4x128xf32>
    tpu.vector_store %arg16[%c1_101, %c0_102, %c0_103], %110 {strides = array<i32>} : memref<2x4x128xf32, #tpu.memory_space<vmem>>, vector<1x4x128xf32>,
    %111 = vector.extract_strided_slice %96 {offsets = [0, 0], sizes = [4, 64], strides = [1, 1]} : vector<8x64xf32> to vector<4x64xf32>
    %c1_104 = arith.constant 1 : index
    %c0_105 = arith.constant 0 : index
    %112 = vector.load %arg18[%c1_104, %c0_105] : memref<80x128xf32, #tpu.memory_space<vmem>>, vector<4x64xf32>
    tpu.vector_store %arg18[%c1_104, %c0_105], %111 {strides = array<i32>} : memref<80x128xf32, #tpu.memory_space<vmem>>, vector<4x64xf32>,
    %113 = vector.extract_strided_slice %96 {offsets = [4, 0], sizes = [4, 64], strides = [1, 1]} : vector<8x64xf32> to vector<4x64xf32>
    %c41_106 = arith.constant 41 : index
    %c0_107 = arith.constant 0 : index
    %114 = vector.load %arg18[%c41_106, %c0_107] : memref<80x128xf32, #tpu.memory_space<vmem>>, vector<4x64xf32>
    tpu.vector_store %arg18[%c41_106, %c0_107], %113 {strides = array<i32>} : memref<80x128xf32, #tpu.memory_space<vmem>>, vector<4x64xf32>,
    %c0_108 = arith.constant 0 : index
    %c0_109 = arith.constant 0 : index
    %115 = tpu.strided_load %arg18[%c0_108, %c0_109] {strides = array<i32: 2, 1>} : memref<80x128xf32, #tpu.memory_space<vmem>>, vector<2x64xf32>
    %c1_110 = arith.constant 1 : index
    %c0_111 = arith.constant 0 : index
    %116 = tpu.strided_load %arg18[%c1_110, %c0_111] {strides = array<i32: 2, 1>} : memref<80x128xf32, #tpu.memory_space<vmem>>, vector<2x64xf32>
    %c2_112 = arith.constant 2 : index
    %c0_113 = arith.constant 0 : index
    %117 = tpu.strided_load %arg18[%c2_112, %c0_113] {strides = array<i32: 2, 1>} : memref<80x128xf32, #tpu.memory_space<vmem>>, vector<2x64xf32>
    %118 = tpu.concatenate %115, %116, %117 in 1 : vector<2x64xf32>, vector<2x64xf32>, vector<2x64xf32> -> vector<2x192xf32>
    %c40_114 = arith.constant 40 : index
    %c0_115 = arith.constant 0 : index
    %119 = tpu.strided_load %arg18[%c40_114, %c0_115] {strides = array<i32: 2, 1>} : memref<80x128xf32, #tpu.memory_space<vmem>>, vector<2x64xf32>
    %c41_116 = arith.constant 41 : index
    %c0_117 = arith.constant 0 : index
    %120 = tpu.strided_load %arg18[%c41_116, %c0_117] {strides = array<i32: 2, 1>} : memref<80x128xf32, #tpu.memory_space<vmem>>, vector<2x64xf32>
    %c42_118 = arith.constant 42 : index
    %c0_119 = arith.constant 0 : index
    %121 = tpu.strided_load %arg18[%c42_118, %c0_119] {strides = array<i32: 2, 1>} : memref<80x128xf32, #tpu.memory_space<vmem>>, vector<2x64xf32>
    %122 = tpu.concatenate %119, %120, %121 in 1 : vector<2x64xf32>, vector<2x64xf32>, vector<2x64xf32> -> vector<2x192xf32>
    %123 = tpu.concatenate %118, %122 in 0 : vector<2x192xf32>, vector<2x192xf32> -> vector<4x192xf32>
    %124 = arith.truncf %123 : vector<4x192xf32> to vector<4x192xbf16>
    %c0_120 = arith.constant 0 : index
    %c0_121 = arith.constant 0 : index
    %125 = vector.load %arg11[%c0_120, %c0_121] : memref<192x32xbf16, #tpu.memory_space<vmem>>, vector<192x32xbf16>
    %cst_122 = arith.constant dense<0.000000e+00> : vector<4x32xf32>
    %126 = tpu.matmul %124, %125, %cst_122 {dimension_numbers = #tpu.dot_dimension_numbers<[1], [0], [0], [1], [0, 0, 1, 1], [], []>} : vector<4x192xbf16>, vector<192x32xbf16>, vector<4x32xf32> -> vector<4x32xf32>
    %c0_123 = arith.constant 0 : index
    %c0_124 = arith.constant 0 : index
    %127 = vector.load %arg13[%c0_123, %c0_124] : memref<2x64xf32, #tpu.memory_space<vmem>>, vector<1x32xf32>
    %128 = vector.broadcast %127 : vector<1x32xf32> to vector<4x32xf32>
    %129 = arith.addf %126, %128 : vector<4x32xf32>
    %cst_125 = arith.constant 0.000000e+00 : f32
    %130 = vector.broadcast %cst_125 : f32 to vector<4x32xf32>
    %131 = arith.maximumf %129, %130 : vector<4x32xf32>
    %132 = arith.truncf %131 : vector<4x32xf32> to vector<4x32xbf16>
    %c0_126 = arith.constant 0 : index
    %c0_127 = arith.constant 0 : index
    %133 = vector.load %arg12[%c0_126, %c0_127] : memref<32x64xbf16, #tpu.memory_space<vmem>>, vector<32x64xbf16>
    %cst_128 = arith.constant dense<0.000000e+00> : vector<4x64xf32>
    %134 = tpu.matmul %132, %133, %cst_128 {dimension_numbers = #tpu.dot_dimension_numbers<[1], [0], [0], [1], [0, 0, 1, 1], [], []>} : vector<4x32xbf16>, vector<32x64xbf16>, vector<4x64xf32> -> vector<4x64xf32>
    %c1_129 = arith.constant 1 : index
    %c0_130 = arith.constant 0 : index
    %135 = vector.load %arg13[%c1_129, %c0_130] : memref<2x64xf32, #tpu.memory_space<vmem>>, vector<1x64xf32>
    %136 = vector.broadcast %135 : vector<1x64xf32> to vector<4x64xf32>
    %137 = arith.addf %134, %136 : vector<4x64xf32>
    %138 = vector.extract_strided_slice %137 {offsets = [0, 0], sizes = [2, 64], strides = [1, 1]} : vector<4x64xf32> to vector<2x64xf32>
    %c0_131 = arith.constant 0 : index
    %c0_132 = arith.constant 0 : index
    %c0_133 = arith.constant 0 : index
    %139 = vector.load %arg17[%c0_131, %c0_132, %c0_133] : memref<2x2x64xf32, #tpu.memory_space<vmem>>, vector<1x2x64xf32>
    %140 = vector.shape_cast %139 : vector<1x2x64xf32> to vector<2x64xf32>
    %141 = vector.shape_cast %138 : vector<2x64xf32> to vector<1x2x64xf32>
    tpu.vector_store %arg17[%c0_131, %c0_132, %c0_133], %141 {strides = array<i32>} : memref<2x2x64xf32, #tpu.memory_space<vmem>>, vector<1x2x64xf32>,
    %142 = vector.extract_strided_slice %137 {offsets = [2, 0], sizes = [2, 64], strides = [1, 1]} : vector<4x64xf32> to vector<2x64xf32>
    %c1_134 = arith.constant 1 : index
    %c0_135 = arith.constant 0 : index
    %c0_136 = arith.constant 0 : index
    %143 = vector.load %arg17[%c1_134, %c0_135, %c0_136] : memref<2x2x64xf32, #tpu.memory_space<vmem>>, vector<1x2x64xf32>
    %144 = vector.shape_cast %143 : vector<1x2x64xf32> to vector<2x64xf32>
    %145 = vector.shape_cast %142 : vector<2x64xf32> to vector<1x2x64xf32>
    tpu.vector_store %arg17[%c1_134, %c0_135, %c0_136], %145 {strides = array<i32>} : memref<2x2x64xf32, #tpu.memory_space<vmem>>, vector<1x2x64xf32>,
    return
  }
  func.func @transform_0(%arg0: i32) -> (i32, i32, i32) {
    %c0_i32 = arith.constant 0 : i32
    %c0_i32_0 = arith.constant 0 : i32
    %c0_i32_1 = arith.constant 0 : i32
    return %arg0, %c0_i32, %c0_i32_0 : i32, i32, i32
  }
  func.func @transform_1(%arg0: i32) -> (i32, i32) {
    %c0_i32 = arith.constant 0 : i32
    %c0_i32_0 = arith.constant 0 : i32
    %c0_i32_1 = arith.constant 0 : i32
    return %c0_i32, %c0_i32_0 : i32, i32
  }
  func.func @transform_2(%arg0: i32) -> (i32, i32) {
    %c0_i32 = arith.constant 0 : i32
    %c0_i32_0 = arith.constant 0 : i32
    %c0_i32_1 = arith.constant 0 : i32
    return %c0_i32, %c0_i32_0 : i32, i32
  }
  func.func @transform_3(%arg0: i32) -> (i32, i32) {
    %c0_i32 = arith.constant 0 : i32
    %c0_i32_0 = arith.constant 0 : i32
    %c0_i32_1 = arith.constant 0 : i32
    return %c0_i32, %c0_i32_0 : i32, i32
  }
  func.func @transform_4(%arg0: i32) -> (i32, i32) {
    %c0_i32 = arith.constant 0 : i32
    %c0_i32_0 = arith.constant 0 : i32
    %c0_i32_1 = arith.constant 0 : i32
    return %c0_i32, %c0_i32_0 : i32, i32
  }
  func.func @transform_5(%arg0: i32) -> (i32, i32) {
    %c0_i32 = arith.constant 0 : i32
    %c0_i32_0 = arith.constant 0 : i32
    %c0_i32_1 = arith.constant 0 : i32
    return %c0_i32, %c0_i32_0 : i32, i32
  }
  func.func @transform_6(%arg0: i32) -> (i32, i32) {
    %c0_i32 = arith.constant 0 : i32
    %c0_i32_0 = arith.constant 0 : i32
    %c0_i32_1 = arith.constant 0 : i32
    return %c0_i32, %c0_i32_0 : i32, i32
  }
  func.func @transform_7(%arg0: i32) -> (i32, i32) {
    %c0_i32 = arith.constant 0 : i32
    %c0_i32_0 = arith.constant 0 : i32
    %c0_i32_1 = arith.constant 0 : i32
    return %c0_i32, %c0_i32_0 : i32, i32
  }
  func.func @transform_8(%arg0: i32) -> (i32, i32) {
    %c0_i32 = arith.constant 0 : i32
    %c0_i32_0 = arith.constant 0 : i32
    %c0_i32_1 = arith.constant 0 : i32
    return %c0_i32, %c0_i32_0 : i32, i32
  }
  func.func @transform_9(%arg0: i32) -> (i32, i32) {
    %c0_i32 = arith.constant 0 : i32
    %c0_i32_0 = arith.constant 0 : i32
    %c0_i32_1 = arith.constant 0 : i32
    return %c0_i32, %c0_i32_0 : i32, i32
  }
  func.func @transform_10(%arg0: i32) -> (i32, i32) {
    %c0_i32 = arith.constant 0 : i32
    %c0_i32_0 = arith.constant 0 : i32
    %c0_i32_1 = arith.constant 0 : i32
    return %c0_i32, %c0_i32_0 : i32, i32
  }
  func.func @transform_11(%arg0: i32) -> (i32, i32) {
    %c0_i32 = arith.constant 0 : i32
    %c0_i32_0 = arith.constant 0 : i32
    %c0_i32_1 = arith.constant 0 : i32
    return %c0_i32, %c0_i32_0 : i32, i32
  }
  func.func @transform_12(%arg0: i32) -> (i32, i32) {
    %c0_i32 = arith.constant 0 : i32
    %c0_i32_0 = arith.constant 0 : i32
    %c0_i32_1 = arith.constant 0 : i32
    return %c0_i32, %c0_i32_0 : i32, i32
  }
  func.func @transform_13(%arg0: i32) -> (i32, i32, i32) {
    %c0_i32 = arith.constant 0 : i32
    %c0_i32_0 = arith.constant 0 : i32
    %c0_i32_1 = arith.constant 0 : i32
    return %arg0, %c0_i32, %c0_i32_0 : i32, i32, i32
  }
  func.func @transform_14(%arg0: i32) -> (i32, i32, i32) {
    %c0_i32 = arith.constant 0 : i32
    %c0_i32_0 = arith.constant 0 : i32
    %c0_i32_1 = arith.constant 0 : i32
    return %arg0, %c0_i32, %c0_i32_0 : i32, i32, i32
  }
  func.func @transform_15(%arg0: i32) -> (i32, i32, i32) {
    %c0_i32 = arith.constant 0 : i32
    %c0_i32_0 = arith.constant 0 : i32
    %c0_i32_1 = arith.constant 0 : i32
    return %arg0, %c0_i32, %c0_i32_0 : i32, i32, i32
  }
  func.func @transform_16(%arg0: i32) -> (i32, i32, i32) {
    %c0_i32 = arith.constant 0 : i32
    %c0_i32_0 = arith.constant 0 : i32
    %c0_i32_1 = arith.constant 0 : i32
    return %arg0, %c0_i32, %c0_i32_0 : i32, i32, i32
  }
}

</mosaic_0001>

<bundles_post_ra>
// kernel: sparse4d_backbone_forward.1
= control target key start
LH: loop header
LB: loop body
LE: loop exit
PB: predicated region body
PF: predicated region fallthrough
CT: control target
= control target key end

     0   :  { %v2357_v1 = vmov 0.0   ;;  %vm2359_vm0 = vmmov 0   ;;  %vm1205_vm1 = vcmask 1043456   ;;  %vm1577_vm2 = vcmask 523268   ;;  %s2360_s26 = smov 64   ;;  %s3049_s1 = inlined_call_operand.vmem [shape: bf16[384,128], index: 1, kind: input, shape index: {}]   ;;  %s3050_s0 = inlined_call_operand.vmem [shape: f32[2,32,128], index: 0, kind: input, shape index: {}]   ;;  %s3051_s2 = inlined_call_operand.vmem [shape: bf16[128,512], index: 2, kind: input, shape index: {}]   ;;  %s3052_s4 = inlined_call_operand.vmem [shape: bf16[384,128], index: 4, kind: input, shape index: {}]   ;;  %s3053_s3 = inlined_call_operand.vmem [shape: f32[2,512], index: 3, kind: input, shape index: {}]   ;;  %s3054_s5 = inlined_call_operand.vmem [shape: bf16[128,256], index: 5, kind: input, shape index: {}]   ;;  %s3055_s7 = inlined_call_operand.vmem [shape: bf16[384,64], index: 7, kind: input, shape index: {}]   ;;  %s3056_s13 = inlined_call_operand.vmem [shape: f32[2,16,512], index: 13, kind: output, shape index: {0}]   ;;  %s3057_s6 = inlined_call_operand.vmem [shape: f32[2,256], index: 6, kind: input, shape index: {}]   ;;  %s3058_s8 = inlined_call_operand.vmem [shape: bf16[64,128], index: 8, kind: input, shape index: {}]   ;;  %s3059_s10 = inlined_call_operand.vmem [shape: bf16[192,32], index: 10, kind: input, shape index: {}]   ;;  %s3060_s14 = inlined_call_operand.vmem [shape: f32[2,8,256], index: 14, kind: output, shape index: {1}]   ;;  %s3061_s9 = inlined_call_operand.vmem [shape: f32[2,128], index: 9, kind: input, shape index: {}]   ;;  %s3062_s11 = inlined_call_operand.vmem [shape: bf16[32,64], index: 11, kind: input, shape index: {}]   ;;  %s3063_s15 = inlined_call_operand.vmem [shape: f32[2,4,128], index: 15, kind: output, shape index: {2}]   ;;  %s3064_s12 = inlined_call_operand.vmem [shape: f32[2,64], index: 12, kind: input, shape index: {}]   ;;  %s3065_s16 = inlined_call_operand.vmem [shape: f32[2,2,64], index: 16, kind: output, shape index: {3}]  }
   0x1   :  { %3067 = sst [smem:[#allocation3_spill]] %s3049_s1  ;;  %49 = vst [vmem:[#allocation2] sm:$0x1] %v2357_v1  ;;  %58 = vst [vmem:[#allocation2 + $0x28] sm:$0x1] %v2357_v1  ;;  %v50_v24 = vld [vmem:[%s3050_s0] sm:$0xff] }
   0x2   :  { %s3068_s23 = sld [smem:[#allocation3_spill]]  ;;  %v51_v25 = vld [vmem:[%s3050_s0 + $0x8] sm:$0xff]  ;;  %v52_v26 = vld [vmem:[%s3050_s0 + $0x10] sm:$0xff]  ;;  %v53_v27 = vld [vmem:[%s3050_s0 + $0x18] sm:$0xff]  ;;  %54 = vst [vmem:[#allocation2 + $0x1] sm:$0xff] %v50_v24  ;;  %vm1575_vm3 = vcmask 519168  }
   0x3   :  { %55 = vst [vmem:[#allocation2 + $0x9] sm:$0xff] %v51_v25  ;;  %56 = vst [vmem:[#allocation2 + $0x11] sm:$0xff] %v52_v26  ;;  %v1838_v28 = vld [vmem:[%s3050_s0 + $0x20] sm:$0xff]  ;;  %v1839_v29 = vld [vmem:[%s3050_s0 + $0x28] sm:$0xff]  ;;  %vm1528_vm4 = vcmask 523264   ;;  %vm1601_vm5 = vcmask 1041408  }
   0x4   :  { %57 = vst [vmem:[#allocation2 + $0x19] sm:$0xff] %v53_v27  ;;  %v1840_v30 = vld [vmem:[%s3050_s0 + $0x30] sm:$0xff]  ;;  %v1841_v31 = vld [vmem:[%s3050_s0 + $0x38] sm:$0xff]  ;;  %64 = vst [vmem:[#allocation2 + $0x29] sm:$0xff] %v1838_v28  ;;  %vm1773_vm6 = vcmask 261120   ;;  %vm1817_vm7 = vcmask 517120  }
   0x5   :  { %65 = vst [vmem:[#allocation2 + $0x31] sm:$0xff] %v1839_v29  ;;  %66 = vst [vmem:[#allocation2 + $0x39] sm:$0xff] %v1840_v30  ;;  %v2221_v33 = vld [vmem:[%s3051_s2 + $0x4] ss:$16 sps:$4 sm:$0xff]   ;;  %v2224_v34 = vld [vmem:[%s3051_s2 + $0xc] ss:$16 sps:$4 sm:$0xff]  }
   0x6   :  { %67 = vst [vmem:[#allocation2 + $0x41] sm:$0xff] %v1841_v31  ;;  %v2219_v38 = vld [vmem:[%s3051_s2] ss:$16 sps:$4 sm:$0xff]   ;;  %v2222_v50 = vld [vmem:[%s3051_s2 + $0x8] ss:$16 sps:$4 sm:$0xff]   ;;  %vm1820_vm8 = vcmask 519170  }
   0x7   :  { %v2227_v51 = vld [vmem:[%s3051_s2 + $0x24] ss:$16 sps:$4 sm:$0xff]   ;;  %v2230_v53 = vld [vmem:[%s3051_s2 + $0x2c] ss:$16 sps:$4 sm:$0xff]   ;;  %v2225_v54 = vld [vmem:[%s3051_s2 + $0x20] ss:$16 sps:$4 sm:$0xff]  }
   0x8   :  { %v2195_v0 = vld [vmem:[%s3068_s23 + $0x40] sm:$0xff]   ;;  %v2198_v4 = vld [vmem:[%s3068_s23 + $0x48] sm:$0xff]   ;;  %v2201_v7 = vld [vmem:[%s3068_s23 + $0x50] sm:$0xff]  }
   0x9   :  { %v2196_v2 = vld [vmem:[%s3068_s23] sm:$0xff]   ;;  %2003 = vmatprep.subr.bf16.mxu0 %v2195_v0  ;;  %v2199_v5 = vld [vmem:[%s3068_s23 + $0x8] sm:$0xff]   ;;  %v2202_v8 = vld [vmem:[%s3068_s23 + $0x10] sm:$0xff]  }
   0xa   :  { %v2197_v3 = vld [vmem:[%s3068_s23 + $0x80] sm:$0xff]   ;;  %2004 = vmatpush3.bf16.msra.mxu0 %v2196_v2  ;;  %v2200_v6 = vld [vmem:[%s3068_s23 + $0x88] sm:$0xff]   ;;  %v2203_v9 = vld [vmem:[%s3068_s23 + $0x90] sm:$0xff]  }
   0xb   :  { %2111 = vmatprep.subr.bf16.mxu1 %v2197_v3  ;;  %2005 = vmatprep.subr.bf16.mxu0 %v2198_v4  ;;  %v2204_v10 = vld [vmem:[%s3068_s23 + $0x58] sm:$0xff]   ;;  %v2207_v13 = vld [vmem:[%s3068_s23 + $0x60] sm:$0xff]   ;;  %v2210_v16 = vld [vmem:[%s3068_s23 + $0x68] sm:$0xff]  }
   0xc   :  { %2112 = vmatpush3.bf16.msra.mxu1 %v2197_v3  ;;  %v2205_v11 = vld [vmem:[%s3068_s23 + $0x18] sm:$0xff]   ;;  %v2209_v14 = vld [vmem:[%s3068_s23 + $0xa0] sm:$0xff]   ;;  %v2212_v17 = vld [vmem:[%s3068_s23 + $0xa8] sm:$0xff]  }
   0xd   :  { %2113 = vmatprep.subr.bf16.mxu1 %v2200_v6  ;;  %v2206_v12 = vld [vmem:[%s3068_s23 + $0x98] sm:$0xff]   ;;  %v2208_v15 = vld [vmem:[%s3068_s23 + $0x20] sm:$0xff]   ;;  %v2211_v18 = vld [vmem:[%s3068_s23 + $0x28] sm:$0xff]  }
   0xe   :  { %2006 = vmatpush3.bf16.msra.mxu0 %v2199_v5  ;;  %v2213_v19 = vld [vmem:[%s3068_s23 + $0x70] sm:$0xff]   ;;  %v2216_v22 = vld [vmem:[%s3068_s23 + $0x78] sm:$0xff]   ;;  %v72_v35 = vld [vmem:[#allocation2 + $0x1] ss:$2 sm:$0xff] }
   0xf   :  { %2007 = vmatprep.subr.bf16.mxu0 %v2201_v7  ;;  %v2214_v20 = vld [vmem:[%s3068_s23 + $0x30] sm:$0xff]   ;;  %v2218_v23 = vld [vmem:[%s3068_s23 + $0xb8] sm:$0xff]   ;;  %v68_v36 = vld [vmem:[#allocation2] ss:$2 sm:$0xff] }
  0x10   :  { %2114 = vmatpush3.bf16.msra.mxu1 %v2200_v6  ;;  %v2215_v21 = vld [vmem:[%s3068_s23 + $0xb0] sm:$0xff]   ;;  %v2217_v32 = vld [vmem:[%s3068_s23 + $0x38] sm:$0xff]   ;;  %v1842_v25 = vld [vmem:[%s3053_s3] ss:$0 sm:$0xff] }
  0x11   :  { %2115 = vmatprep.subr.bf16.mxu1 %v2203_v9  ;;  %v76_v37 = vld [vmem:[#allocation2 + $0x2] ss:$2 sm:$0xff]  ;;  %v74_v39 = vld [vmem:[#allocation2 + $0x11] ss:$2 sm:$0xff]  ;;  %v78_v41 = vld [vmem:[#allocation2 + $0x12] ss:$2 sm:$0xff] }
  0x12   :  { %2008 = vmatpush3.bf16.msra.mxu0 %v2202_v8  ;;  %v70_v40 = vld [vmem:[#allocation2 + $0x10] ss:$2 sm:$0xff]  ;;  %v92_v42 = vpack.c.bf16 %v74_v39, %v72_v35  ;;  %v93_v44 = vpack.c.bf16 %v78_v41, %v76_v37  ;;  %v84_v47 = vld [vmem:[#allocation2 + $0x29] ss:$2 sm:$0xff]  ;;  %v86_v49 = vld [vmem:[#allocation2 + $0x39] ss:$2 sm:$0xff] }
  0x13   :  { %2009 = vmatprep.subr.bf16.mxu0 %v2204_v10  ;;  %v91_v43 = vpack.c.bf16 %v70_v40, %v68_v36  ;;  %v88_v45 = vld [vmem:[#allocation2 + $0x2a] ss:$2 sm:$0xff]  ;;  %v90_v46 = vld [vmem:[#allocation2 + $0x3a] ss:$2 sm:$0xff]  ;;  %v95_v52 = vpack.c.bf16 %v86_v49, %v84_v47 }
  0x14   :  { %2116 = vmatpush3.bf16.msra.mxu1 %v2203_v9  ;;  %v96_v48 = vpack.c.bf16 %v90_v46, %v88_v45  ;;  %326 = vmatprep.mubr.bf16.mxu0 %v92_v42  ;;  %v80_v55 = vld [vmem:[#allocation2 + $0x28] ss:$2 sm:$0xff]  ;;  %v82_v56 = vld [vmem:[#allocation2 + $0x38] ss:$2 sm:$0xff] }
  0x15   :  { %2117 = vmatprep.subr.bf16.mxu1 %v2206_v12  ;;  %2127 = vmatprep.mubr.bf16.mxu1 %v93_v44  ;;  %v2228_v57 = vld [vmem:[%s3051_s2 + $0x28] ss:$16 sps:$4 sm:$0xff]   ;;  %v2233_v58 = vld [vmem:[%s3051_s2 + $0x44] ss:$16 sps:$4 sm:$0xff]   ;;  %v2236_v59 = vld [vmem:[%s3051_s2 + $0x4c] ss:$16 sps:$4 sm:$0xff]   ;;  %v94_v60 = vpack.c.bf16 %v82_v56, %v80_v55 }
  0x16   :  { %2010 = vmatpush3.bf16.msra.mxu0 %v2205_v11  ;;  %v2231_v61 = vld [vmem:[%s3051_s2 + $0x40] ss:$16 sps:$4 sm:$0xff]   ;;  %v2234_v62 = vld [vmem:[%s3051_s2 + $0x48] ss:$16 sps:$4 sm:$0xff]   ;;  %v2239_v63 = vld [vmem:[%s3051_s2 + $0x64] ss:$16 sps:$4 sm:$0xff]  }
  0x17   :  { %2011 = vmatprep.subr.bf16.mxu0 %v2207_v13  ;;  %v2242_v0 = vld [vmem:[%s3051_s2 + $0x6c] ss:$16 sps:$4 sm:$0xff]   ;;  %v2237_v2 = vld [vmem:[%s3051_s2 + $0x60] ss:$16 sps:$4 sm:$0xff]   ;;  %v2240_v3 = vld [vmem:[%s3051_s2 + $0x68] ss:$16 sps:$4 sm:$0xff]  }
  0x18   :  { %2118 = vmatpush3.bf16.msra.mxu1 %v2206_v12  ;;  %v2245_v4 = vld [vmem:[%s3051_s2 + $0x84] ss:$16 sps:$4 sm:$0xff]   ;;  %v2248_v5 = vld [vmem:[%s3051_s2 + $0x8c] ss:$16 sps:$4 sm:$0xff]   ;;  %v2243_v6 = vld [vmem:[%s3051_s2 + $0x80] ss:$16 sps:$4 sm:$0xff]  }
  0x19   :  { %2119 = vmatprep.subr.bf16.mxu1 %v2209_v14  ;;  %v2246_v7 = vld [vmem:[%s3051_s2 + $0x88] ss:$16 sps:$4 sm:$0xff]   ;;  %v2251_v8 = vld [vmem:[%s3051_s2 + $0xa4] ss:$16 sps:$4 sm:$0xff]   ;;  %v2254_v9 = vld [vmem:[%s3051_s2 + $0xac] ss:$16 sps:$4 sm:$0xff]  }
  0x1a   :  { %2012 = vmatpush3.bf16.msra.mxu0 %v2208_v15  ;;  %v2249_v10 = vld [vmem:[%s3051_s2 + $0xa0] ss:$16 sps:$4 sm:$0xff]   ;;  %v2252_v11 = vld [vmem:[%s3051_s2 + $0xa8] ss:$16 sps:$4 sm:$0xff]   ;;  %v2257_v12 = vld [vmem:[%s3051_s2 + $0xc4] ss:$16 sps:$4 sm:$0xff]  }
  0x1b   :  { %2013 = vmatprep.subr.bf16.mxu0 %v2210_v16  ;;  %v2260_v13 = vld [vmem:[%s3051_s2 + $0xcc] ss:$16 sps:$4 sm:$0xff]   ;;  %v2258_v15 = vld [vmem:[%s3051_s2 + $0xc8] ss:$16 sps:$4 sm:$0xff]   ;;  %v2263_v16 = vld [vmem:[%s3051_s2 + $0xe4] ss:$16 sps:$4 sm:$0xff]  }
  0x1c   :  { %2120 = vmatpush3.bf16.msra.mxu1 %v2209_v14  ;;  %v2255_v14 = vld [vmem:[%s3051_s2 + $0xc0] ss:$16 sps:$4 sm:$0xff]   ;;  %v2270_v49 = vld [vmem:[%s3052_s4 + $0x48] sm:$0xff]  }
  0x1d   :  { %2121 = vmatprep.subr.bf16.mxu1 %v2212_v17  ;;  %v2268_v44 = vld [vmem:[%s3052_s4] sm:$0xff]   ;;  %v2273_v56 = vld [vmem:[%s3052_s4 + $0x50] sm:$0xff]  }
  0x1e   :  { %2014 = vmatpush3.bf16.msra.mxu0 %v2211_v18  ;;  %v2261_v18 = vld [vmem:[%s3051_s2 + $0xe0] ss:$16 sps:$4 sm:$0xff]  }
  0x1f   :  { %2015 = vmatprep.subr.bf16.mxu0 %v2213_v19  ;;  %v2264_v19 = vld [vmem:[%s3051_s2 + $0xe8] ss:$16 sps:$4 sm:$0xff]   ;;  %v2269_v45 = vld [vmem:[%s3052_s4 + $0x80] sm:$0xff]  }
  0x20   :  { %2122 = vmatpush3.bf16.msra.mxu1 %v2212_v17  ;;  %v2266_v17 = vld [vmem:[%s3051_s2 + $0xec] ss:$16 sps:$4 sm:$0xff]  }
  0x21   :  { %2123 = vmatprep.subr.bf16.mxu1 %v2215_v21 }
  0x22   :  { %2016 = vmatpush3.bf16.msra.mxu0 %v2214_v20  ;;  %v2267_v20 = vld [vmem:[%s3052_s4 + $0x40] sm:$0xff]  }
  0x23   :  { %2017 = vmatprep.subr.bf16.mxu0 %v2216_v22 }
  0x24   :  { %2124 = vmatpush3.bf16.msra.mxu1 %v2215_v21  ;;  %v2358_v21 = vmov 0  }
  0x25   :  { %2125 = vmatprep.subr.bf16.mxu1 %v2218_v23 }
  0x26   :  { %2018 = vmatpush3.bf16.msra.mxu0 %v2217_v32 }
  0x27   :  { %613 = vmatprep.subr.bf16.mxu0 %v2221_v33 }
  0x28   :  { %2126 = vmatpush3.bf16.msra.mxu1 %v2218_v23 }
  0x29   :  { %666 = vmatprep.subr.bf16.mxu1 %v2224_v34  ;;  %327 = vmatmul.mubr.bf16.vlgmr.msra.gmra.mrb[0].mxu0 %v91_v43 }
  0x2a   :  { %334 = vmatprep.mubr.bf16.mxu0 %v95_v52  ;;  %614 = vmatpush1.bf16.msra.mxu0 %v2219_v38  ;;  %v2271_v52 = vld [vmem:[%s3052_s4 + $0x8] sm:$0xff]  }
  0x2b   :  { %2128 = vmatmul.mubr.bf16.vlgmr.msra.gmra.mrb[0].mxu1 %v96_v48  ;;  %615 = vmatprep.subr.bf16.mxu0 %v2227_v51 }
  0x2c   :  { %667 = vmatpush1.bf16.msra.mxu1 %v2222_v50  ;;  %698 = vmatprep.mubr.bf16.mxu1 %v2358_v21 }
  0x2d   :  { %668 = vmatprep.subr.bf16.mxu1 %v2230_v53  ;;  %v2272_v53 = vld [vmem:[%s3052_s4 + $0x88] sm:$0xff]  }
  0x2e   :  { %616 = vmatpush1.bf16.msra.mxu0 %v2225_v54 }
  0x2f   :  { %617 = vmatprep.subr.bf16.mxu0 %v2233_v58  ;;  %v2274_v58 = vld [vmem:[%s3052_s4 + $0x10] sm:$0xff]  }
  0x30   :  { %669 = vmatpush1.bf16.msra.mxu1 %v2228_v57 }
  0x31   :  { %670 = vmatprep.subr.bf16.mxu1 %v2236_v59  ;;  %335 = vmatmul.mubr.bf16.gmra.mrb[4].mxu0 %v94_v60  ;;  %v2275_v59 = vld [vmem:[%s3052_s4 + $0x90] sm:$0xff]  }
  0x32   :  { %618 = vmatpush1.bf16.msra.mxu0 %v2231_v61  ;;  %645 = vmatprep.mubr.bf16.mxu0 %v2358_v21  ;;  %v2276_v61 = vld [vmem:[%s3052_s4 + $0x58] sm:$0xff]  }
  0x33   :  { %619 = vmatprep.subr.bf16.mxu0 %v2239_v63  ;;  %v2278_v63 = vld [vmem:[%s3052_s4 + $0x98] sm:$0xff]  }
  0x34   :  { %671 = vmatpush1.bf16.msra.mxu1 %v2234_v62  ;;  %v2277_v62 = vld [vmem:[%s3052_s4 + $0x18] sm:$0xff]  }
  0x35   :  { %672 = vmatprep.subr.bf16.mxu1 %v2242_v0  ;;  %v2279_v0 = vld [vmem:[%s3052_s4 + $0x60] sm:$0xff]  }
  0x36   :  { %620 = vmatpush1.bf16.msra.mxu0 %v2237_v2  ;;  %v2280_v2 = vld [vmem:[%s3052_s4 + $0x20] sm:$0xff]  }
  0x37   :  { %621 = vmatprep.subr.bf16.mxu0 %v2245_v4 }
  0x38   :  { %673 = vmatpush1.bf16.msra.mxu1 %v2240_v3 }
  0x39   :  { %674 = vmatprep.subr.bf16.mxu1 %v2248_v5  ;;  %v2281_v5 = vld [vmem:[%s3052_s4 + $0xa0] sm:$0xff]  }
  0x3a   :  { %622 = vmatpush1.bf16.msra.mxu0 %v2243_v6 }
  0x3b   :  { %623 = vmatprep.subr.bf16.mxu0 %v2251_v8  ;;  %v2283_v8 = vld [vmem:[%s3052_s4 + $0x28] sm:$0xff]  }
  0x3c   :  { %675 = vmatpush1.bf16.msra.mxu1 %v2246_v7  ;;  %v2282_v7 = vld [vmem:[%s3052_s4 + $0x68] sm:$0xff]  }
  0x3d   :  { %676 = vmatprep.subr.bf16.mxu1 %v2254_v9  ;;  %v2284_v9 = vld [vmem:[%s3052_s4 + $0xa8] sm:$0xff]  }
  0x3e   :  { %624 = vmatpush1.bf16.msra.mxu0 %v2249_v10  ;;  %v2285_v10 = vld [vmem:[%s3052_s4 + $0x70] sm:$0xff]  }
  0x3f   :  { %625 = vmatprep.subr.bf16.mxu0 %v2257_v12  ;;  %v2287_v12 = vld [vmem:[%s3052_s4 + $0xb0] sm:$0xff]  }
  0x40   :  { %677 = vmatpush1.bf16.msra.mxu1 %v2252_v11  ;;  %v2286_v11 = vld [vmem:[%s3052_s4 + $0x30] sm:$0xff]  }
  0x41   :  { %678 = vmatprep.subr.bf16.mxu1 %v2260_v13  ;;  %v2288_v13 = vld [vmem:[%s3052_s4 + $0x78] sm:$0xff]  }
  0x42   :  { %626 = vmatpush1.bf16.msra.mxu0 %v2255_v14  ;;  %v2289_v14 = vld [vmem:[%s3052_s4 + $0x38] sm:$0xff]  }
  0x43   :  { %627 = vmatprep.subr.bf16.mxu0 %v2263_v16 }
  0x44   :  { %679 = vmatpush1.bf16.msra.mxu1 %v2258_v15  ;;  %v2290_v15 = vld [vmem:[%s3052_s4 + $0xb8] sm:$0xff]  }
  0x45   :  { %680 = vmatprep.subr.bf16.mxu1 %v2266_v17 }
  0x46   :  { %628 = vmatpush1.bf16.msra.mxu0 %v2261_v18 }
  0x47   :  { %2041 = vmatprep.subr.bf16.mxu0 %v2267_v20 }
  0x48   :  { %681 = vmatpush1.bf16.msra.mxu1 %v2264_v19 }
  0x49   :  { %2131 = vmatprep.subr.bf16.mxu1 %v2357_v1 }
  0xfc   :  { %v2019_v22 = vpop.f32.mrb[0].mxu0 }
  0xfd   :  { %v2020_v24 = vpop.f32.mrb[1].mxu0 }
  0xfe   :  { %v2129_v23 = vpop.f32.mrb[0].mxu1  ;;  %v2021_v27 = vadd.f32 %v2020_v24, %v2019_v22  ;;  %v2022_v28 = vpop.f32.mrb[2].mxu0  ;;  %v2291_v24 = vld [vmem:[%s3054_s5] ss:$8 sps:$4 sm:$0xff]  }
  0xff   :  { %v377_v26 = vpop.f32.mrb[1].mxu1  ;;  %v2023_v30 = vpop.f32.mrb[3].mxu0 }
 0x100   :  { %v2130_v29 = vpop.f32.mrb[2].mxu1  ;;  %v329_v32 = vadd.f32 %v2021_v27, %v1842_v25  ;;  %v2024_v33 = vadd.f32 %v2023_v30, %v2022_v28  ;;  %v2299_v27 = vld [vmem:[%s3054_s5 + $0x24] ss:$8 sps:$4 sm:$0xff]   ;;  %v2297_v28 = vld [vmem:[%s3054_s5 + $0x20] ss:$8 sps:$4 sm:$0xff]  }
 0x101   :  { %v380_v31 = vpop.f32.mrb[3].mxu1  ;;  %v2304_v30 = vld [vmem:[%s3055_s7] sm:$0xff]  }
 0x102   :  { %v378_v34 = vadd.f32 %v377_v26, %v329_v32  ;;  %v332_v35 = vadd.f32 %v2024_v33, %v1842_v25  ;;  %v2296_v26 = vld [vmem:[%s3054_s5 + $0x14] ss:$8 sps:$4 sm:$0xff]   ;;  %v2300_v32 = vld [vmem:[%s3054_s5 + $0x30] ss:$8 sps:$4 sm:$0xff]   ;;  %v2308_v33 = vld [vmem:[%s3055_s7 + $0x48] sm:$0xff]  }
 0x104   :  { %v392_v36 = vmax.f32 %v378_v34, 0.0  ;;  %v381_v37 = vadd.f32 %v380_v31, %v332_v35  ;;  %v2025_v38 = vpop.f32.mrb[4].mxu0  ;;  %v2302_v31 = vld [vmem:[%s3054_s5 + $0x34] ss:$8 sps:$4 sm:$0xff]   ;;  %v2307_v34 = vld [vmem:[%s3054_s5 + $0x44] ss:$8 sps:$4 sm:$0xff]  }
 0x105   :  { %v2026_v39 = vpop.f32.mrb[5].mxu0  ;;  %v2309_v35 = vld [vmem:[%s3055_s7 + $0x8] sm:$0xff]  }
 0x106   :  { %736 = vst [vmem:[#allocation2 + $0x1] sm:$0xff] %v392_v36  ;;  %v393_v40 = vmax.f32 %v381_v37, 0.0  ;;  %v2027_v41 = vadd.f32 %v2026_v39, %v2025_v38  ;;  %v2028_v42 = vpop.f32.mrb[6].mxu0  ;;  %v2312_v37 = vld [vmem:[%s3054_s5 + $0x54] ss:$8 sps:$4 sm:$0xff]  }
 0x107   :  { %v2029_v43 = vpop.f32.mrb[7].mxu0  ;;  %v2310_v38 = vld [vmem:[%s3054_s5 + $0x50] ss:$8 sps:$4 sm:$0xff]  }
 0x108   :  { %v396_v46 = vpack.c.bf16 %v393_v40, %v392_v36  ;;  %737 = vst [vmem:[#allocation2 + $0x9] sm:$0xff] %v393_v40  ;;  %v337_v47 = vadd.f32 %v2027_v41, %v1842_v25  ;;  %v2030_v48 = vadd.f32 %v2029_v43, %v2028_v42  ;;  %v2305_v36 = vld [vmem:[%s3054_s5 + $0x40] ss:$8 sps:$4 sm:$0xff]   ;;  %v2313_v39 = vld [vmem:[%s3055_s7 + $0x50] sm:$0xff]   ;;  %v2317_v41 = vld [vmem:[%s3054_s5 + $0x64] ss:$8 sps:$4 sm:$0xff]  }
 0x109   :  { %v2314_v40 = vld [vmem:[%s3055_s7 + $0x10] sm:$0xff]   ;;  %v2315_v42 = vld [vmem:[%s3054_s5 + $0x60] ss:$8 sps:$4 sm:$0xff]   ;;  %v2318_v43 = vld [vmem:[%s3055_s7 + $0x58] sm:$0xff]  }
 0x10a   :  { %v386_v50 = vadd.f32 %v2129_v23, %v337_v47  ;;  %v340_v51 = vadd.f32 %v2030_v48, %v1842_v25  ;;  %646 = vmatmul.mubr.bf16.vlgmr.msra.gmra.mrb[8].mxu0 %v396_v46  ;;  %699 = vmatmul.mubr.bf16.vlgmr.msra.gmra.mrb[4].mxu1 %v396_v46  ;;  %v2293_v23 = vld [vmem:[%s3054_s5 + $0x4] ss:$8 sps:$4 sm:$0xff]   ;;  %v2294_v25 = vld [vmem:[%s3054_s5 + $0x10] ss:$8 sps:$4 sm:$0xff]  }
 0x10b   :  { %2042 = vmatpush3.bf16.msra.mxu0 %v2268_v44  ;;  %2132 = vmatpush3.bf16.msra.mxu1 %v2269_v45  ;;  %v2319_v44 = vld [vmem:[%s3055_s7 + $0x18] sm:$0xff]   ;;  %v2323_v47 = vld [vmem:[%s3055_s7 + $0x60] sm:$0xff]  }
 0x10c   :  { %v394_v54 = vmax.f32 %v386_v50, 0.0  ;;  %v389_v55 = vadd.f32 %v2130_v29, %v340_v51  ;;  %2043 = vmatprep.subr.bf16.mxu0 %v2270_v49  ;;  %2133 = vmatprep.subr.bf16.mxu1 %v2357_v1  ;;  %v2303_v29 = vld [vmem:[%s3055_s7 + $0x40] sm:$0xff]   ;;  %v2322_v45 = vld [vmem:[%s3054_s5 + $0x74] ss:$8 sps:$4 sm:$0xff]   ;;  %v2320_v46 = vld [vmem:[%s3054_s5 + $0x70] ss:$8 sps:$4 sm:$0xff]  }
 0x10d   :  { %655 = vmatprep.mubr.bf16.mxu0 %v2358_v21  ;;  %708 = vmatprep.mubr.bf16.mxu1 %v2358_v21  ;;  %v2324_v48 = vld [vmem:[%s3055_s7 + $0x20] sm:$0xff]   ;;  %v2325_v49 = vld [vmem:[%s3055_s7 + $0x68] sm:$0xff]   ;;  %v2328_v51 = vld [vmem:[%s3055_s7 + $0x70] sm:$0xff]  }
 0x10e   :  { %738 = vst [vmem:[#allocation2 + $0x29] sm:$0xff] %v394_v54  ;;  %v395_v57 = vmax.f32 %v389_v55, 0.0  ;;  %v2327_v50 = vld [vmem:[%s3055_s7 + $0x28] sm:$0xff]   ;;  %v433_v55 = vlaneseq }
 0x10f   :  { %2044 = vmatpush3.bf16.msra.mxu0 %v2271_v52  ;;  %2134 = vmatpush3.bf16.msra.mxu1 %v2272_v53  ;;  %v741_v3 = vld [vmem:[#allocation2 + $0x1] ss:$2 sm:$0xff]  ;;  %v740_v18 = vld [vmem:[#allocation2] ss:$2 sm:$0xff]  ;;  %v2330_v52 = vld [vmem:[%s3055_s7 + $0x30] sm:$0xff]  }
 0x110   :  { %739 = vst [vmem:[#allocation2 + $0x31] sm:$0xff] %v395_v57  ;;  %2045 = vmatprep.subr.bf16.mxu0 %v2273_v56  ;;  %2135 = vmatprep.subr.bf16.mxu1 %v2357_v1  ;;  %v397_v60 = vpack.c.bf16 %v395_v57, %v394_v54  ;;  %v742_v19 = vld [vmem:[#allocation2 + $0x2] ss:$2 sm:$0xff]  ;;  %v2331_v53 = vld [vmem:[%s3055_s7 + $0x78] sm:$0xff]   ;;  %v2828_v56 = vshrl.u32 %v433_v55, 7 }
 0x111   :  { %v2333_v54 = vld [vmem:[%s3055_s7 + $0x38] sm:$0xff]   ;;  %v2329_v55 = vld [vmem:[%s3055_s7 + $0x88] sm:$0xff]  }
 0x112   :  { %656 = vmatmul.mubr.bf16.gmra.mrb[12].mxu0 %v397_v60  ;;  %709 = vmatmul.mubr.bf16.gmra.mrb[8].mxu1 %v397_v60  ;;  %v435_v57 = vsub.s32 0, %v2828_v56  ;;  %v439_v60 = vsub.s32 1, %v2828_v56 }
 0x113   :  { %2046 = vmatpush3.bf16.msra.mxu0 %v2274_v58  ;;  %2136 = vmatpush3.bf16.msra.mxu1 %v2275_v59  ;;  %v443_v58 = vsub.s32 2, %v2828_v56  ;;  %v1867_v59 = vld [vmem:[%s3053_s3 + $0x1] ss:$2 sm:$0xf] }
 0x114   :  { %2047 = vmatprep.subr.bf16.mxu0 %v2276_v61  ;;  %2137 = vmatprep.subr.bf16.mxu1 %v2357_v1  ;;  %v447_v61 = vsub.s32 3, %v2828_v56 }
 0x115   :  { %2147 = vmatprep.mubr.msk.bf16.mxu1 %vm2359_vm0, %v2357_v1 }
 0x117   :  { %2048 = vmatpush3.bf16.msra.mxu0 %v2277_v62  ;;  %2138 = vmatpush3.bf16.msra.mxu1 %v2278_v63  ;;  %v744_v4 = vld [vmem:[#allocation2 + $0x29] ss:$2 sm:$0xff]  ;;  %v743_v16 = vld [vmem:[#allocation2 + $0x28] ss:$2 sm:$0xff]  ;;  %v436_v62 = vrot.slane %v1867_v59, %v435_v57  ;;  %v444_v63 = vrot.slane %v1867_v59, %v443_v58 }
 0x118   :  { %2049 = vmatprep.subr.bf16.mxu0 %v2279_v0  ;;  %2139 = vmatprep.subr.bf16.mxu1 %v2357_v1  ;;  %v747_v6 = vpack.c.bf16 %v744_v4, %v741_v3  ;;  %v745_v17 = vld [vmem:[#allocation2 + $0x2a] ss:$2 sm:$0xff]  ;;  %v746_v20 = vpack.c.bf16 %v743_v16, %v740_v18  ;;  %v440_v0 = vrot.slane %v1867_v59, %v439_v60 }
 0x119   :  { %v748_v22 = vpack.c.bf16 %v745_v17, %v742_v19  ;;  %v2332_v58 = vld [vmem:[%s3055_s7 + $0x90] sm:$0xff]  }
 0x11a   :  { %978 = vmatprep.mubr.bf16.mxu0 %v747_v6 }
 0x11b   :  { %2050 = vmatpush3.bf16.msra.mxu0 %v2280_v2  ;;  %2140 = vmatpush3.bf16.msra.mxu1 %v2281_v5  ;;  %v448_v2 = vrot.slane %v1867_v59, %v447_v61 }
 0x11c   :  { %2051 = vmatprep.subr.bf16.mxu0 %v2282_v7  ;;  %2141 = vmatprep.subr.bf16.mxu1 %v2357_v1 }
 0x11f   :  { %2052 = vmatpush3.bf16.msra.mxu0 %v2283_v8  ;;  %2142 = vmatpush3.bf16.msra.mxu1 %v2284_v9 }
 0x120   :  { %2053 = vmatprep.subr.bf16.mxu0 %v2285_v10  ;;  %2143 = vmatprep.subr.bf16.mxu1 %v2357_v1 }
 0x123   :  { %2054 = vmatpush3.bf16.msra.mxu0 %v2286_v11  ;;  %2144 = vmatpush3.bf16.msra.mxu1 %v2287_v12 }
 0x124   :  { %2055 = vmatprep.subr.bf16.mxu0 %v2288_v13  ;;  %2145 = vmatprep.subr.bf16.mxu1 %v2357_v1 }
 0x127   :  { %2056 = vmatpush3.bf16.msra.mxu0 %v2289_v14  ;;  %2146 = vmatpush3.bf16.msra.mxu1 %v2290_v15 }
 0x128   :  { %1140 = vmatprep.subr.bf16.mxu0 %v2293_v23  ;;  %2072 = vmatprep.subr.bf16.mxu1 %v2303_v29 }
 0x12a   :  { %979 = vmatmul.mubr.bf16.vlgmr.msra.gmra.mrb[16].mxu0 %v746_v20  ;;  %2148 = vmatmul.mubr.bf16.vlgmr.msra.gmra.mrb[12].mxu1 %v748_v22 }
 0x12b   :  { %1172 = vmatprep.mubr.bf16.mxu0 %v2358_v21  ;;  %1141 = vmatpush1.bf16.msra.mxu0 %v2291_v24 }
 0x12c   :  { %1142 = vmatprep.subr.bf16.mxu0 %v2296_v26  ;;  %2073 = vmatpush3.bf16.msra.mxu1 %v2304_v30 }
 0x12d   :  { %2074 = vmatprep.subr.bf16.mxu1 %v2308_v33 }
 0x12f   :  { %1143 = vmatpush1.bf16.msra.mxu0 %v2294_v25 }
 0x130   :  { %1144 = vmatprep.subr.bf16.mxu0 %v2299_v27  ;;  %2075 = vmatpush3.bf16.msra.mxu1 %v2309_v35 }
 0x131   :  { %2076 = vmatprep.subr.bf16.mxu1 %v2313_v39 }
 0x133   :  { %1145 = vmatpush1.bf16.msra.mxu0 %v2297_v28 }
 0x134   :  { %1146 = vmatprep.subr.bf16.mxu0 %v2302_v31  ;;  %2077 = vmatpush3.bf16.msra.mxu1 %v2314_v40 }
 0x135   :  { %2078 = vmatprep.subr.bf16.mxu1 %v2318_v43 }
 0x137   :  { %1147 = vmatpush1.bf16.msra.mxu0 %v2300_v32 }
 0x138   :  { %1148 = vmatprep.subr.bf16.mxu0 %v2307_v34  ;;  %2079 = vmatpush3.bf16.msra.mxu1 %v2319_v44 }
 0x139   :  { %2080 = vmatprep.subr.bf16.mxu1 %v2323_v47 }
 0x13b   :  { %1149 = vmatpush1.bf16.msra.mxu0 %v2305_v36 }
 0x13c   :  { %1150 = vmatprep.subr.bf16.mxu0 %v2312_v37  ;;  %2081 = vmatpush3.bf16.msra.mxu1 %v2324_v48 }
 0x13d   :  { %2082 = vmatprep.subr.bf16.mxu1 %v2325_v49 }
 0x13f   :  { %1151 = vmatpush1.bf16.msra.mxu0 %v2310_v38  ;;  %v1908_v38 = vld [vmem:[%s3057_s6] ss:$0 sm:$0xff] }
 0x140   :  { %1152 = vmatprep.subr.bf16.mxu0 %v2317_v41  ;;  %2083 = vmatpush3.bf16.msra.mxu1 %v2327_v50 }
 0x141   :  { %2084 = vmatprep.subr.bf16.mxu1 %v2328_v51 }
 0x143   :  { %1153 = vmatpush1.bf16.msra.mxu0 %v2315_v42 }
 0x144   :  { %1154 = vmatprep.subr.bf16.mxu0 %v2322_v45  ;;  %2085 = vmatpush3.bf16.msra.mxu1 %v2330_v52 }
 0x145   :  { %2086 = vmatprep.subr.bf16.mxu1 %v2331_v53  ;;  %v2326_v53 = vld [vmem:[%s3055_s7 + $0x80] sm:$0xff]  }
 0x147   :  { %1155 = vmatpush1.bf16.msra.mxu0 %v2320_v46 }
 0x148   :  { %2151 = vmatprep.subr.bf16.mxu0 %v2357_v1  ;;  %2087 = vmatpush3.bf16.msra.mxu1 %v2333_v54 }
 0x149   :  { %1710 = vmatprep.subr.bf16.mxu1 %v2358_v21 }
 0x1dd   :  { %v647_v3 = vpop.f32.mrb[8].mxu0  ;;  %v700_v4 = vpop.f32.mrb[4].mxu1 }
 0x1de   :  { %v648_v5 = vadd.f32 %v647_v3, %v436_v62  ;;  %v701_v6 = vadd.f32 %v700_v4, %v444_v63  ;;  %v649_v7 = vpop.f32.mrb[9].mxu0  ;;  %v702_v8 = vpop.f32.mrb[5].mxu1 }
 0x1df   :  { %v650_v9 = vadd.f32 %v649_v7, %v440_v0  ;;  %v703_v10 = vadd.f32 %v702_v8, %v448_v2  ;;  %v651_v11 = vpop.f32.mrb[10].mxu0  ;;  %v704_v12 = vpop.f32.mrb[6].mxu1  ;;  %v2334_v7 = vld [vmem:[%s3055_s7 + $0x98] sm:$0xff]   ;;  %v2335_v8 = vld [vmem:[%s3055_s7 + $0xa0] sm:$0xff]  }
 0x1e0   :  { %719 = vst [vmem:[%s3056_s13] sm:$0xff] %v648_v5  ;;  %721 = vst [vmem:[%s3056_s13 + $0x10] sm:$0xff] %v701_v6  ;;  %v652_v13 = vadd.f32 %v651_v11, %v436_v62  ;;  %v705_v14 = vadd.f32 %v704_v12, %v444_v63  ;;  %v653_v15 = vpop.f32.mrb[11].mxu0  ;;  %v706_v16 = vpop.f32.mrb[7].mxu1  ;;  %v2337_v11 = vld [vmem:[%s3055_s7 + $0xb0] sm:$0xff]  }
 0x1e1   :  { %720 = vst [vmem:[%s3056_s13 + $0x8] sm:$0xff] %v650_v9  ;;  %722 = vst [vmem:[%s3056_s13 + $0x18] sm:$0xff] %v703_v10  ;;  %v654_v17 = vadd.f32 %v653_v15, %v440_v0  ;;  %v707_v18 = vadd.f32 %v706_v16, %v448_v2  ;;  %v2336_v9 = vld [vmem:[%s3055_s7 + $0xa8] sm:$0xff]  }
 0x1e2   :  { %723 = vst [vmem:[%s3056_s13 + $0x20] sm:$0xff] %v652_v13  ;;  %725 = vst [vmem:[%s3056_s13 + $0x30] sm:$0xff] %v705_v14  ;;  %v2338_v13 = vld [vmem:[%s3055_s7 + $0xb8] sm:$0xff]  }
 0x1e3   :  { %724 = vst [vmem:[%s3056_s13 + $0x28] sm:$0xff] %v654_v17  ;;  %726 = vst [vmem:[%s3056_s13 + $0x38] sm:$0xff] %v707_v18  ;;  %v2339_v17 = vld [vmem:[%s3058_s8] sm:$0xff]   ;;  %v2340_v18 = vld [vmem:[%s3058_s8 + $0x8] sm:$0xff]  }
 0x1e5   :  { %v657_v19 = vpop.f32.mrb[12].mxu0  ;;  %v710_v20 = vpop.f32.mrb[8].mxu1 }
 0x1e6   :  { %v658_v22 = vadd.f32 %v657_v19, %v436_v62  ;;  %v711_v23 = vadd.f32 %v710_v20, %v444_v63  ;;  %v659_v24 = vpop.f32.mrb[13].mxu0  ;;  %v712_v25 = vpop.f32.mrb[9].mxu1  ;;  %v2341_v19 = vld [vmem:[%s3058_s8 + $0x10] sm:$0xff]   ;;  %v2342_v20 = vld [vmem:[%s3058_s8 + $0x18] sm:$0xff]  }
 0x1e7   :  { %v660_v26 = vadd.f32 %v659_v24, %v440_v0  ;;  %v713_v27 = vadd.f32 %v712_v25, %v448_v2  ;;  %v661_v28 = vpop.f32.mrb[14].mxu0  ;;  %v714_v29 = vpop.f32.mrb[10].mxu1  ;;  %v2345_v24 = vld [vmem:[%s3059_s10 + $0x10] sm:$0xff]   ;;  %v2346_v25 = vld [vmem:[%s3059_s10 + $0x18] sm:$0xff]  }
 0x1e8   :  { %1900 = vst [vmem:[%s3056_s13 + $0x40] sm:$0xff] %v658_v22  ;;  %1902 = vst [vmem:[%s3056_s13 + $0x50] sm:$0xff] %v711_v23  ;;  %v662_v30 = vadd.f32 %v661_v28, %v436_v62  ;;  %v715_v31 = vadd.f32 %v714_v29, %v444_v63  ;;  %v663_v32 = vpop.f32.mrb[15].mxu0  ;;  %v716_v33 = vpop.f32.mrb[11].mxu1  ;;  %v2343_v22 = vld [vmem:[%s3059_s10] sm:$0xff]   ;;  %v2344_v23 = vld [vmem:[%s3059_s10 + $0x8] sm:$0xff]  }
 0x1e9   :  { %1901 = vst [vmem:[%s3056_s13 + $0x48] sm:$0xff] %v660_v26  ;;  %1903 = vst [vmem:[%s3056_s13 + $0x58] sm:$0xff] %v713_v27  ;;  %v664_v34 = vadd.f32 %v663_v32, %v440_v0  ;;  %v717_v35 = vadd.f32 %v716_v33, %v448_v2  ;;  %v2347_v26 = vld [vmem:[%s3059_s10 + $0x20] sm:$0xff]   ;;  %v2348_v27 = vld [vmem:[%s3059_s10 + $0x28] sm:$0xff]  }
 0x1ea   :  { %1904 = vst [vmem:[%s3056_s13 + $0x60] sm:$0xff] %v662_v30  ;;  %1906 = vst [vmem:[%s3056_s13 + $0x70] sm:$0xff] %v715_v31  ;;  %v2349_v28 = vld [vmem:[%s3059_s10 + $0x30] sm:$0xff]   ;;  %v2350_v29 = vld [vmem:[%s3059_s10 + $0x38] sm:$0xff]  }
 0x1eb   :  { %1905 = vst [vmem:[%s3056_s13 + $0x68] sm:$0xff] %v664_v34  ;;  %1907 = vst [vmem:[%s3056_s13 + $0x78] sm:$0xff] %v717_v35  ;;  %v2351_v30 = vld [vmem:[%s3059_s10 + $0x40] sm:$0xff]   ;;  %v2352_v31 = vld [vmem:[%s3059_s10 + $0x48] sm:$0xff]  }
 0x1ec   :  { %v1933_v32 = vld [vmem:[%s3057_s6 + $0x1] ss:$2 sm:$0x3] }
 0x1ed   :  { %v1053_v33 = vrot.slane %v1933_v32, %v435_v57  ;;  %v1057_v34 = vrot.slane %v1933_v32, %v439_v60 }
 0x1fd   :  { %v2057_v36 = vpop.f32.mrb[16].mxu0  ;;  %v1021_v37 = vpop.f32.mrb[12].mxu1 }
 0x1fe   :  { %v2058_v39 = vpop.f32.mrb[17].mxu0  ;;  %v2149_v40 = vpop.f32.mrb[13].mxu1 }
 0x1ff   :  { %v2059_v41 = vadd.f32 %v2058_v39, %v2057_v36  ;;  %v2060_v42 = vpop.f32.mrb[18].mxu0  ;;  %v1024_v43 = vpop.f32.mrb[14].mxu1 }
 0x200   :  { %v2061_v44 = vpop.f32.mrb[19].mxu0  ;;  %v2150_v45 = vpop.f32.mrb[15].mxu1 }
 0x201   :  { %v981_v46 = vadd.f32 %v2059_v41, %v1908_v38  ;;  %v2062_v47 = vadd.f32 %v2061_v44, %v2060_v42  ;;  %v1952_v45 = vld [vmem:[%s3061_s9] ss:$0 sm:$0xff] }
 0x203   :  { %v1022_v48 = vadd.f32 %v1021_v37, %v981_v46  ;;  %v984_v49 = vadd.f32 %v2062_v47, %v1908_v38 }
 0x205   :  { %v1028_v50 = vmax.f32 %v1022_v48, 0.0  ;;  %v1025_v51 = vadd.f32 %v1024_v43, %v984_v49 }
 0x207   :  { %1188 = vst [vmem:[#allocation2 + $0x1] sm:$0xff] %v1028_v50  ;;  %v1029_v52 = vmax.f32 %v1025_v51, 0.0 }
 0x209   :  { %v1030_v54 = vpack.c.bf16 %v1029_v52, %v1028_v50  ;;  %1189 = vst [vmem:[#allocation2 + $0x29] sm:$0xff] %v1029_v52  ;;  %v2353_v50 = vld [vmem:[%s3059_s10 + $0x50] sm:$0xff]  }
 0x20b   :  { %1173 = vmatmul.mubr.bf16.vlgmr.msra.gmra.mrb[20].mxu0 %v1030_v54 }
 0x20c   :  { %2152 = vmatpush3.bf16.msra.mxu0 %v2326_v53  ;;  %2167 = vmatprep.mubr.msk.bf16.mxu0 %vm2359_vm0, %v2357_v1 }
 0x20d   :  { %2153 = vmatprep.subr.bf16.mxu0 %v2357_v1 }
 0x20e   :  { %v1191_v0 = vld [vmem:[#allocation2 + $0x1] ss:$2 sm:$0xf]  ;;  %v1190_v2 = vld [vmem:[#allocation2] ss:$2 sm:$0xf] }
 0x20f   :  { %v1192_v14 = vld [vmem:[#allocation2 + $0x2] ss:$2 sm:$0xf] }
 0x210   :  { %2154 = vmatpush3.bf16.msra.mxu0 %v2329_v55  ;;  %v1194_v59 = vld [vmem:[#allocation2 + $0x29] ss:$2 sm:$0xf]  ;;  %v1193_v61 = vld [vmem:[#allocation2 + $0x28] ss:$2 sm:$0xf] }
 0x211   :  { %2155 = vmatprep.subr.bf16.mxu0 %v2357_v1  ;;  %v1200_v62 = vrot.slane %v1194_v59, 4  ;;  %v1199_v63 = vrot.slane %v1193_v61, 4  ;;  %v1195_v10 = vld [vmem:[#allocation2 + $0x2a] ss:$2 sm:$0xf]  ;;  %v2354_v55 = vld [vmem:[%s3059_s10 + $0x58] sm:$0xff]  }
 0x212   :  { %v1201_v12 = vrot.slane %v1195_v10, 4 }
 0x213   :  { %v1207_v3 = vsel %vm1205_vm1, %v1191_v0, %v1200_v62  ;;  %v1206_v4 = vsel %vm1205_vm1, %v1190_v2, %v1199_v63  ;;  %v2355_v2 = vld [vmem:[%s3062_s11] sm:$0xff]  }
 0x214   :  { %2156 = vmatpush3.bf16.msra.mxu0 %v2332_v58  ;;  %v1210_v5 = vpack.c.bf16 %v1207_v3, %v1207_v3  ;;  %v1209_v6 = vpack.c.bf16 %v1206_v4, %v1206_v4  ;;  %v1208_v15 = vsel %vm1205_vm1, %v1192_v14, %v1201_v12  ;;  %v1977_v12 = vld [vmem:[%s3061_s9 + $0x1] ss:$0 sm:$0xff] }
 0x215   :  { %2157 = vmatprep.subr.bf16.mxu0 %v2357_v1  ;;  %v1211_v16 = vpack.c.bf16 %v1208_v15, %v1208_v15 }
 0x216   :  { %1441 = vmatprep.mubr.bf16.mxu1 %v1210_v5 }
 0x217   :  { %1442 = vmatmul.mubr.bf16.vlgmr.msra.gmra.mrb[16].mxu1 %v1209_v6 }
 0x218   :  { %2158 = vmatpush3.bf16.msra.mxu0 %v2334_v7  ;;  %1711 = vmatpush1.bf16.msra.mxu1 %v2343_v22 }
 0x219   :  { %2159 = vmatprep.subr.bf16.mxu0 %v2357_v1  ;;  %1712 = vmatprep.subr.bf16.mxu1 %v2358_v21 }
 0x21c   :  { %2160 = vmatpush3.bf16.msra.mxu0 %v2335_v8  ;;  %1713 = vmatpush1.bf16.msra.mxu1 %v2344_v23 }
 0x21d   :  { %2161 = vmatprep.subr.bf16.mxu0 %v2357_v1  ;;  %1714 = vmatprep.subr.bf16.mxu1 %v2358_v21 }
 0x220   :  { %2162 = vmatpush3.bf16.msra.mxu0 %v2336_v9  ;;  %1715 = vmatpush1.bf16.msra.mxu1 %v2345_v24 }
 0x221   :  { %2163 = vmatprep.subr.bf16.mxu0 %v2357_v1  ;;  %1716 = vmatprep.subr.bf16.mxu1 %v2358_v21 }
 0x224   :  { %2164 = vmatpush3.bf16.msra.mxu0 %v2337_v11  ;;  %1717 = vmatpush1.bf16.msra.mxu1 %v2346_v25 }
 0x225   :  { %2165 = vmatprep.subr.bf16.mxu0 %v2357_v1  ;;  %1718 = vmatprep.subr.bf16.mxu1 %v2358_v21 }
 0x228   :  { %2166 = vmatpush3.bf16.msra.mxu0 %v2338_v13  ;;  %1719 = vmatpush1.bf16.msra.mxu1 %v2347_v26 }
 0x229   :  { %2171 = vmatprep.subr.bf16.mxu0 %v2357_v1  ;;  %1720 = vmatprep.subr.bf16.mxu1 %v2358_v21 }
 0x22b   :  { %2168 = vmatmul.mubr.bf16.vlgmr.msra.gmra.mrb[24].mxu0 %v1211_v16 }
 0x22c   :  { %2179 = vmatprep.mubr.msk.bf16.mxu0 %vm2359_vm0, %v2357_v1  ;;  %2172 = vmatpush3.bf16.msra.mxu0 %v2339_v17  ;;  %v2356_v17 = vld [vmem:[%s3062_s11 + $0x8] sm:$0xff]  }
 0x22d   :  { %2173 = vmatprep.subr.bf16.mxu0 %v2357_v1  ;;  %1721 = vmatpush1.bf16.msra.mxu1 %v2348_v27  ;;  %v1998_v27 = vld [vmem:[%s3064_s12 + $0x1] ss:$0 sm:$0xff] }
 0x22e   :  { %1722 = vmatprep.subr.bf16.mxu1 %v2358_v21 }
 0x230   :  { %2174 = vmatpush3.bf16.msra.mxu0 %v2340_v18  ;;  %v1984_v18 = vld [vmem:[%s3064_s12] ss:$0 sm:$0xff] }
 0x231   :  { %2175 = vmatprep.subr.bf16.mxu0 %v2357_v1  ;;  %1723 = vmatpush1.bf16.msra.mxu1 %v2349_v28 }
 0x232   :  { %1724 = vmatprep.subr.bf16.mxu1 %v2358_v21 }
 0x234   :  { %2176 = vmatpush3.bf16.msra.mxu0 %v2341_v19 }
 0x235   :  { %2177 = vmatprep.subr.bf16.mxu0 %v2357_v1  ;;  %1725 = vmatpush1.bf16.msra.mxu1 %v2350_v29 }
 0x236   :  { %1726 = vmatprep.subr.bf16.mxu1 %v2358_v21 }
 0x238   :  { %2178 = vmatpush3.bf16.msra.mxu0 %v2342_v20 }
 0x239   :  { %2183 = vmatprep.subr.bf16.mxu0 %v2357_v1  ;;  %1727 = vmatpush1.bf16.msra.mxu1 %v2351_v30 }
 0x23a   :  { %1728 = vmatprep.subr.bf16.mxu1 %v2358_v21 }
 0x23d   :  { %1729 = vmatpush1.bf16.msra.mxu1 %v2352_v31 }
 0x23e   :  { %1730 = vmatprep.subr.bf16.mxu1 %v2358_v21 }
 0x241   :  { %1731 = vmatpush1.bf16.msra.mxu1 %v2353_v50 }
 0x242   :  { %1732 = vmatprep.subr.bf16.mxu1 %v2358_v21 }
 0x245   :  { %1733 = vmatpush1.bf16.msra.mxu1 %v2354_v55 }
 0x2de   :  { %v1174_v35 = vpop.f32.mrb[20].mxu0 }
 0x2df   :  { %v1175_v36 = vadd.f32 %v1174_v35, %v1053_v33  ;;  %v1176_v37 = vpop.f32.mrb[21].mxu0 }
 0x2e0   :  { %v1177_v38 = vadd.f32 %v1176_v37, %v1057_v34  ;;  %v1178_v39 = vpop.f32.mrb[22].mxu0 }
 0x2e1   :  { %1183 = vst [vmem:[%s3060_s14] sm:$0xff] %v1175_v36  ;;  %v1179_v40 = vadd.f32 %v1178_v39, %v1053_v33  ;;  %v1180_v41 = vpop.f32.mrb[23].mxu0 }
 0x2e2   :  { %1184 = vst [vmem:[%s3060_s14 + $0x8] sm:$0xff] %v1177_v38  ;;  %v1181_v42 = vadd.f32 %v1180_v41, %v1057_v34 }
 0x2e3   :  { %1950 = vst [vmem:[%s3060_s14 + $0x10] sm:$0xff] %v1179_v40 }
 0x2e4   :  { %1951 = vst [vmem:[%s3060_s14 + $0x18] sm:$0xff] %v1181_v42 }
 0x2ea   :  { %v2088_v56 = vpop.f32.mrb[16].mxu1 }
 0x2eb   :  { %v2089_v57 = vpop.f32.mrb[17].mxu1 }
 0x2ec   :  { %v2090_v60 = vadd.f32 %v2089_v57, %v2088_v56  ;;  %v2091_v43 = vpop.f32.mrb[18].mxu1 }
 0x2ed   :  { %v2092_v44 = vpop.f32.mrb[19].mxu1 }
 0x2ee   :  { %v1444_v46 = vadd.f32 %v2090_v60, %v1952_v45 }
 0x2fe   :  { %v1483_v47 = vpop.f32.mrb[24].mxu0 }
 0x2ff   :  { %v1484_v48 = vadd.f32 %v1483_v47, %v1444_v46  ;;  %v2169_v49 = vpop.f32.mrb[25].mxu0 }
 0x300   :  { %v1486_v51 = vpop.f32.mrb[26].mxu0 }
 0x301   :  { %v1489_v52 = vmax.f32 %v1484_v48, 0.0  ;;  %v2170_v53 = vpop.f32.mrb[27].mxu0 }
 0x303   :  { %v1490_v54 = vpack.c.bf16 %v1489_v52, %v1489_v52  ;;  %1578 = vst.msk [vmem:[#allocation2 + $0x25] sm:$0xf0] %vm1577_vm2, %v1489_v52 }
 0x304   :  { %1576 = vst.msk [vmem:[#allocation2 + $0x1] sm:$0xf] %vm1575_vm3, %v1489_v52 }
 0x305   :  { %2180 = vmatmul.mubr.msk.bf16.vlgmr.msra.gmra.mrb[28].mxu0 %vm1528_vm4, %v1490_v54 }
 0x306   :  { %2187 = vmatprep.mubr.msk.bf16.mxu0 %vm2359_vm0, %v2357_v1  ;;  %2184 = vmatpush3.bf16.msra.mxu0 %v2355_v2 }
 0x307   :  { %2185 = vmatprep.subr.bf16.mxu0 %v2357_v1 }
 0x30a   :  { %v1588_v58 = vld [vmem:[#allocation2 + $0x29] ss:$2 sm:$0x3]  ;;  %v1589_v59 = vld [vmem:[#allocation2 + $0x2a] ss:$2 sm:$0x3]  ;;  %2186 = vmatpush3.bf16.msra.mxu0 %v2356_v17 }
 0x30b   :  { %1591 = vrot.lane.b32.xlu0 %v1588_v58, %s2360_s26  ;;  %v1598_v61 = vrot.slane %v1589_v59, 6  ;;  %v1581_v21 = vld [vmem:[#allocation2 + $0x2] ss:$2 sm:$0x3] }
 0x30c   :  { %v1580_v62 = vld [vmem:[#allocation2 + $0x1] ss:$2 sm:$0x3]  ;;  %v1587_v4 = vld [vmem:[#allocation2 + $0x28] ss:$2 sm:$0x3] }
 0x30d   :  { %v1603_v63 = vsel %vm1601_vm5, %v1581_v21, %v1598_v61  ;;  %v1579_v8 = vld [vmem:[#allocation2] ss:$2 sm:$0x3] }
 0x30e   :  { %v1605_v0 = vpack.c.bf16 %v1603_v63, %v1603_v63 }
 0x30f   :  { %1583 = vrot.lane.b32.xlu0 %v1580_v62, %s2360_s26 }
 0x310   :  { %1997 = vmatprep.mubr.msk.bf16.mxu1 %vm1528_vm4, %v1605_v0 }
 0x37d   :  { %v1592_v3 = vpop.permute.xlu0 %1591 }
 0x37e   :  { %v1594_v5 = vsel %vm1528_vm4, %v1587_v4, %v1592_v3 }
 0x37f   :  { %v1597_v6 = vrot.slane %v1594_v5, 6 }
 0x381   :  { %v1584_v7 = vpop.permute.xlu0 %1583 }
 0x382   :  { %v1586_v9 = vsel %vm1528_vm4, %v1579_v8, %v1584_v7 }
 0x383   :  { %v1602_v10 = vsel %vm1601_vm5, %v1586_v9, %v1597_v6 }
 0x384   :  { %v1604_v11 = vpack.c.bf16 %v1602_v10, %v1602_v10 }
 0x386   :  { %1743 = vmatmul.mubr.bf16.vlgmr.msra.gmra.mrb[20].mxu1 %v1604_v11 }
 0x3d8   :  { %v1566_v13 = vpop.f32.mrb[28].mxu0 }
 0x3d9   :  { %v1567_v14 = vadd.f32 %v1977_v12, %v1566_v13  ;;  %v2181_v1 = vpop.f32.mrb[29].mxu0 }
 0x3da   :  { %v1569_v15 = vpop.f32.mrb[30].mxu0 }
 0x3db   :  { %1572 = vst [vmem:[%s3063_s15] sm:$0xff] %v1567_v14   ;;  %v2182_v16 = vpop.f32.mrb[31].mxu0 }
 0x459   :  { %v1744_v19 = vpop.f32.mrb[20].mxu1 }
 0x45a   :  { %v1745_v20 = vadd.f32 %v1984_v18, %v1744_v19  ;;  %v1746_v22 = vpop.f32.mrb[21].mxu1 }
 0x45b   :  { %v1747_v23 = vpop.f32.mrb[22].mxu1 }
 0x45c   :  { %v1750_v24 = vmax.f32 %v1745_v20, 0.0  ;;  %v1748_v25 = vpop.f32.mrb[23].mxu1 }
 0x45e   :  { %v1751_v26 = vpack.c.bf16 %v1750_v24, %v1750_v24 }
 0x460   :  { %2188 = vmatmul.mubr.msk.bf16.vlgmr.msra.gmra.mrb[32].mxu0 %vm1773_vm6, %v1751_v26 }
 0x533   :  { %v1811_v28 = vpop.f32.mrb[32].mxu0 }
 0x534   :  { %v1812_v29 = vadd.f32 %v1998_v27, %v1811_v28  ;;  %v2189_v30 = vpop.f32.mrb[33].mxu0 }
 0x535   :  { %v1814_v31 = vpop.f32.mrb[34].mxu0 }
 0x536   :  { %1818 = vst.msk [vmem:[%s3065_s16] sm:$0x3] %vm1817_vm7, %v1812_v29  ;;  %v2190_v32 = vpop.f32.mrb[35].mxu0 }
 0x537   :  { %2002 = vst.msk [vmem:[%s3065_s16] sm:$0xc] %vm1820_vm8, %v1812_v29 }

</bundles_post_ra>
